<compile_context>
chip_gen: v6e
topology: v6e:2x2x1
jax: 0.10.0
libtpu: 0.0.40
codegen_flags: <defaults>
</compile_context>

<pallas_src>
import functools

import numpy as np

import jax
import jax.numpy as jnp
from jax.experimental import pallas as pl
from jax.experimental.pallas import tpu as pltpu


# ----------------------------- Pallas kernels ------------------------------

def _conv1_kernel(p_ref, w_ref, b_ref, o_ref, *, scale):
    """a1 = relu((scale * patches) @ w1 + b1); bf16 MXU, f32 accumulate/elementwise."""
    x = (p_ref[...] * scale).astype(jnp.bfloat16)          # x/255 fused here
    y = jnp.dot(x, w_ref[...], preferred_element_type=jnp.float32)
    o_ref[...] = jnp.maximum(y + b_ref[...], 0.0)


def _head_kernel(a1_ref, m2_ref, b2_ref, m3_ref, b3_ref, wfc_ref, bfc_ref,
                 wh_ref, bh_ref, logits_ref, logp_ref, value_ref, *, n_actions):
    """conv2 + conv3 (Toeplitz matmuls) + fc + merged actor|critic + log-softmax.

    Every layer is a bf16 MXU matmul with f32 accumulation; bias/ReLU/softmax in f32.
    All intermediates stay in registers/VMEM -- nothing touches HBM until the
    final (tiny) logits / log_probs / value stores.
    """
    def dense(x, w_ref, b_ref, relu):
        y = jnp.dot(x.astype(jnp.bfloat16), w_ref[...],
                    preferred_element_type=jnp.float32) + b_ref[...]
        return jnp.maximum(y, 0.0) if relu else y

    a2 = dense(a1_ref[...], m2_ref, b2_ref, True)    # conv2  -> [N, OH2*OW2*32]
    a3 = dense(a2, m3_ref, b3_ref, True)             # conv3  -> [N, OH3*OW3*64]
    feat = dense(a3, wfc_ref, bfc_ref, True)         # fc     -> [N, 256]
    head = dense(feat, wh_ref, bh_ref, False)        # actor|critic -> [N, A+1]

    logits = head[:, :n_actions]
    value = head[:, n_actions:]
    # Categorical(logits).logits == normalized log-probs (log-softmax epilogue).
    m = jnp.max(logits, axis=-1, keepdims=True)
    z = logits - m
    lse = jnp.log(jnp.sum(jnp.exp(z), axis=-1, keepdims=True))

    logits_ref[...] = logits
    logp_ref[...] = z - lse
    value_ref[...] = value


# --------------------------- pallas_call wrappers ---------------------------

def conv1_pallas(patches, w1, b1, *, scale):
    """relu((scale*patches) @ w1 + b1). patches:[M,K] f32, w1:[K,C] bf16, b1:[1,C]."""
    M, K = patches.shape
    _, C = w1.shape
    kern = functools.partial(_conv1_kernel, scale=scale)
    return pl.pallas_call(
        kern,
        grid=(1,),
        in_specs=[pl.BlockSpec((M, K), lambda i: (0, 0)),
                  pl.BlockSpec((K, C), lambda i: (0, 0)),
                  pl.BlockSpec((1, C), lambda i: (0, 0))],
        out_specs=pl.BlockSpec((M, C), lambda i: (0, 0)),
        out_shape=jax.ShapeDtypeStruct((M, C), jnp.float32),
        compiler_params=pltpu.CompilerParams(dimension_semantics=("arbitrary",)),
    )(patches, w1, b1)


def head_pallas(a1_flat, prep):
    """conv2+conv3+fc+actor|critic+log_softmax in one fused kernel."""
    n = a1_flat.shape[0]
    n_actions = prep["wh"].shape[1] - 1
    ins = [a1_flat, prep["m2"], prep["b2"], prep["m3"], prep["b3"],
           prep["wfc"], prep["bfc"], prep["wh"], prep["bh"]]
    in_specs = [pl.BlockSpec(a.shape, lambda i: (0, 0)) for a in ins]
    out_shape = (jax.ShapeDtypeStruct((n, n_actions), jnp.float32),
                 jax.ShapeDtypeStruct((n, n_actions), jnp.float32),
                 jax.ShapeDtypeStruct((n, 1), jnp.float32))
    out_specs = (pl.BlockSpec((n, n_actions), lambda i: (0, 0)),
                 pl.BlockSpec((n, n_actions), lambda i: (0, 0)),
                 pl.BlockSpec((n, 1), lambda i: (0, 0)))
    kern = functools.partial(_head_kernel, n_actions=n_actions)
    return pl.pallas_call(
        kern,
        grid=(1,),
        in_specs=in_specs,
        out_specs=out_specs,
        out_shape=out_shape,
        compiler_params=pltpu.CompilerParams(dimension_semantics=("arbitrary",)),
    )(*ins)


# ------------------------------- JAX glue ----------------------------------

def im2col(x, kh, kw, stride):
    """x:[N,C,H,W] -> patches [N*OH*OW, C*KH*KW] (C-major, matches torch w.reshape)."""
    n, c, h, w = x.shape
    oh = (h - kh) // stride + 1
    ow = (w - kw) // stride + 1
    cols = []
    for i in range(kh):
        for j in range(kw):
            cols.append(x[:, :, i:i + stride * oh:stride, j:j + stride * ow:stride])
    p = jnp.stack(cols, axis=2)                  # [N, C, KH*KW, OH, OW]
    p = p.reshape(n, c * kh * kw, oh, ow)        # flatten order = (C, KH, KW)
    p = p.transpose(0, 2, 3, 1).reshape(n * oh * ow, c * kh * kw)
    return p, oh, ow


def conv_to_matmul_matrix(w, in_h, in_w, stride):
    """Dense matmul ("Toeplitz") form of a valid-padding Conv2d (built once at prep).

    w: [Cout, Cin, KH, KW] (torch layout), numpy f32.
    Returns M [in_h*in_w*Cin, out_h*out_w*Cout] such that, for an activation
    flattened row-per-sample with index (ih*in_w+iw)*Cin + ci and an output
    flattened with index (oh*out_w+ow)*Cout + co:  out = act_flat @ M.
    """
    cout, cin, kh, kw = w.shape
    out_h = (in_h - kh) // stride + 1
    out_w = (in_w - kw) // stride + 1
    w_hwio = np.transpose(w, (2, 3, 1, 0))       # [KH, KW, Cin, Cout]
    m = np.zeros((in_h * in_w * cin, out_h * out_w * cout), np.float32)
    for oy in range(out_h):
        for ox in range(out_w):
            c0 = (oy * out_w + ox) * cout
            for ky in range(kh):
                for kx in range(kw):
                    iy, ix = oy * stride + ky, ox * stride + kx
                    r0 = (iy * in_w + ix) * cin
                    m[r0:r0 + cin, c0:c0 + cout] = w_hwio[ky, kx]
    return m


def init_params(key, in_channels, n_actions, conv_out_size):
    """Deterministic PyTorch-style uniform(+-1/sqrt(fan_in)) init (torch layouts)."""
    ks = jax.random.split(key, 12)

    def u(k, shape, fan_in):
        bound = 1.0 / jnp.sqrt(jnp.float32(fan_in))
        return jax.random.uniform(k, shape, jnp.float32, -bound, bound)

    return {
        "c1_w": u(ks[0], (16, in_channels, 8, 8), in_channels * 64),
        "c1_b": u(ks[1], (16,), in_channels * 64),
        "c2_w": u(ks[2], (32, 16, 4, 4), 16 * 16),
        "c2_b": u(ks[3], (32,), 16 * 16),
        "c3_w": u(ks[4], (64, 32, 3, 3), 32 * 9),
        "c3_b": u(ks[5], (64,), 32 * 9),
        "fc_w": u(ks[6], (256, conv_out_size), conv_out_size),
        "fc_b": u(ks[7], (256,), conv_out_size),
        "actor_w": u(ks[8], (n_actions, 256), 256),
        "actor_b": u(ks[9], (n_actions,), 256),
        "critic_w": u(ks[10], (1, 256), 256),
        "critic_b": u(ks[11], (1,), 256),
    }


def prepare_params(params, in_hw):
    """One-time prep: reshape/transpose/Toeplitz-expand all weights, cast to bf16."""
    def out_hw(hw, k, s):
        return ((hw[0] - k) // s + 1, (hw[1] - k) // s + 1)

    h1 = out_hw(in_hw, 8, 4)
    h2 = out_hw(h1, 4, 2)
    h3 = out_hw(h2, 3, 1)

    c1_w = np.asarray(params["c1_w"], np.float32)
    w1 = c1_w.reshape(c1_w.shape[0], -1).T                         # [Cin*KH*KW, 16]
    m2 = conv_to_matmul_matrix(np.asarray(params["c2_w"], np.float32), h1[0], h1[1], 2)
    b2 = np.tile(np.asarray(params["c2_b"], np.float32), h2[0] * h2[1])
    m3 = conv_to_matmul_matrix(np.asarray(params["c3_w"], np.float32), h2[0], h2[1], 1)
    b3 = np.tile(np.asarray(params["c3_b"], np.float32), h3[0] * h3[1])

    # fc: torch flattens conv output as (C, H, W); our conv3 columns are (H, W, C).
    c3 = params["c3_w"].shape[0]
    fcw = np.asarray(params["fc_w"], np.float32)
    fcw = fcw.reshape(fcw.shape[0], c3, h3[0], h3[1]).transpose(2, 3, 1, 0)
    fcw = fcw.reshape(h3[0] * h3[1] * c3, -1)                      # [conv_out, 256]

    wh = np.concatenate([np.asarray(params["actor_w"], np.float32).T,
                         np.asarray(params["critic_w"], np.float32).T], axis=1)
    bh = np.concatenate([np.asarray(params["actor_b"], np.float32),
                         np.asarray(params["critic_b"], np.float32)])

    return {
        "w1": jnp.asarray(w1, jnp.bfloat16),
        "b1": jnp.asarray(np.asarray(params["c1_b"], np.float32).reshape(1, -1)),
        "m2": jnp.asarray(m2, jnp.bfloat16),
        "b2": jnp.asarray(b2.reshape(1, -1)),
        "m3": jnp.asarray(m3, jnp.bfloat16),
        "b3": jnp.asarray(b3.reshape(1, -1)),
        "wfc": jnp.asarray(fcw, jnp.bfloat16),
        "bfc": jnp.asarray(np.asarray(params["fc_b"], np.float32).reshape(1, -1)),
        "wh": jnp.asarray(wh, jnp.bfloat16),
        "bh": jnp.asarray(bh.reshape(1, -1)),
    }


def agent_forward(prep, x):
    """x:[N,C,H,W] float in [0,255]. Returns (logits, log_probs, value)."""
    n = x.shape[0]
    # conv1: im2col in the wrapper (input comes from HBM anyway); scale + matmul +
    # bias + ReLU fused in Pallas kernel A.
    patches1, oh1, ow1 = im2col(x, 8, 8, 4)
    a1 = conv1_pallas(patches1, prep["w1"], prep["b1"], scale=1.0 / 255.0)
    # Free row-major metadata reshape: row-per-position -> row-per-sample.
    a1_flat = a1.reshape(n, oh1 * ow1 * prep["w1"].shape[1])
    # TODO(synk): torch.distributions.Categorical has no Pallas equivalent; the
    # distribution is returned as (raw logits, normalized log-probs).
    logits, log_probs, value = head_pallas(a1_flat, prep)
    return logits, log_probs, value


if __name__ == "__main__":
    key = jax.random.PRNGKey(0)
    k_in, k_par = jax.random.split(key)

    # Small shapes consistent with the module: 36x36 frames -> conv spatial
    # sizes 8 -> 3 -> 1, so conv_out_size = 64 * 1 * 1 = 64.
    N, C, H, W = 2, 4, 36, 36
    n_actions = 6
    conv_out_size = 64

    x = jax.random.uniform(k_in, (N, C, H, W), jnp.float32, 0.0, 255.0)
    params = init_params(k_par, C, n_actions, conv_out_size)
    prep = prepare_params(params, (H, W))

    fwd = jax.jit(agent_forward)
    logits, log_probs, value = fwd(prep, x)
    jax.block_until_ready((logits, log_probs, value))

    assert logits.shape == (N, n_actions)
    assert log_probs.shape == (N, n_actions)
    assert value.shape == (N, 1)
    print("KERNEL_OK")
</pallas_src>

<mosaic_0001>
module attributes {stable_mosaic.version = 11 : i64} {
  func.func @_conv1_kernel(%arg0: i32, %arg1: memref<128x256xf32, #tpu.memory_space<vmem>>, %arg2: memref<256x16xbf16, #tpu.memory_space<vmem>>, %arg3: memref<1x16xf32, #tpu.memory_space<vmem>>, %arg4: memref<128x16xf32, #tpu.memory_space<vmem>>) attributes {dimension_semantics = [#tpu.dimension_semantics<arbitrary>], iteration_bounds = array<i64: 1>, scalar_prefetch = 0 : i64, scratch_operands = 0 : i64, tpu.core_type = #tpu.core_type<tc>, window_params = [{pipeline_mode = #tpu.pipeline_mode<synchronous>, transform_indices = @transform_0, window_bounds = array<i64: 128, 256>}, {pipeline_mode = #tpu.pipeline_mode<synchronous>, transform_indices = @transform_1, window_bounds = array<i64: 256, 16>}, {pipeline_mode = #tpu.pipeline_mode<synchronous>, transform_indices = @transform_2, window_bounds = array<i64: 1, 16>}, {pipeline_mode = #tpu.pipeline_mode<synchronous>, transform_indices = @transform_3, window_bounds = array<i64: 128, 16>}]} {
    %c0 = arith.constant 0 : index
    %c0_0 = arith.constant 0 : index
    %0 = vector.load %arg1[%c0, %c0_0] : memref<128x256xf32, #tpu.memory_space<vmem>>, vector<128x256xf32>
    %cst = arith.constant 0.00392156886 : f32
    %1 = vector.broadcast %cst : f32 to vector<128x256xf32>
    %2 = arith.mulf %0, %1 : vector<128x256xf32>
    %3 = arith.truncf %2 : vector<128x256xf32> to vector<128x256xbf16>
    %c0_1 = arith.constant 0 : index
    %c0_2 = arith.constant 0 : index
    %4 = vector.load %arg2[%c0_1, %c0_2] : memref<256x16xbf16, #tpu.memory_space<vmem>>, vector<256x16xbf16>
    %cst_3 = arith.constant dense<0.000000e+00> : vector<128x16xf32>
    %5 = tpu.matmul %3, %4, %cst_3 {dimension_numbers = #tpu.dot_dimension_numbers<[1], [0], [0], [1], [0, 0, 1, 1], [], []>} : vector<128x256xbf16>, vector<256x16xbf16>, vector<128x16xf32> -> vector<128x16xf32>
    %c0_4 = arith.constant 0 : index
    %c0_5 = arith.constant 0 : index
    %6 = vector.load %arg3[%c0_4, %c0_5] : memref<1x16xf32, #tpu.memory_space<vmem>>, vector<1x16xf32>
    %7 = vector.broadcast %6 : vector<1x16xf32> to vector<128x16xf32>
    %8 = arith.addf %5, %7 : vector<128x16xf32>
    %cst_6 = arith.constant 0.000000e+00 : f32
    %9 = vector.broadcast %cst_6 : f32 to vector<128x16xf32>
    %10 = arith.maximumf %8, %9 : vector<128x16xf32>
    %c0_7 = arith.constant 0 : index
    %c0_8 = arith.constant 0 : index
    %11 = vector.load %arg4[%c0_7, %c0_8] : memref<128x16xf32, #tpu.memory_space<vmem>>, vector<128x16xf32>
    tpu.vector_store %arg4[%c0_7, %c0_8], %10 {strides = array<i32>} : memref<128x16xf32, #tpu.memory_space<vmem>>, vector<128x16xf32>,
    return
  }
  func.func @transform_0(%arg0: i32) -> (i32, i32) {
    %c0_i32 = arith.constant 0 : i32
    %c0_i32_0 = arith.constant 0 : i32
    %c0_i32_1 = arith.constant 0 : i32
    return %c0_i32, %c0_i32_0 : i32, i32
  }
  func.func @transform_1(%arg0: i32) -> (i32, i32) {
    %c0_i32 = arith.constant 0 : i32
    %c0_i32_0 = arith.constant 0 : i32
    %c0_i32_1 = arith.constant 0 : i32
    return %c0_i32, %c0_i32_0 : i32, i32
  }
  func.func @transform_2(%arg0: i32) -> (i32, i32) {
    %c0_i32 = arith.constant 0 : i32
    %c0_i32_0 = arith.constant 0 : i32
    %c0_i32_1 = arith.constant 0 : i32
    return %c0_i32, %c0_i32_0 : i32, i32
  }
  func.func @transform_3(%arg0: i32) -> (i32, i32) {
    %c0_i32 = arith.constant 0 : i32
    %c0_i32_0 = arith.constant 0 : i32
    %c0_i32_1 = arith.constant 0 : i32
    return %c0_i32, %c0_i32_0 : i32, i32
  }
}

module attributes {stable_mosaic.version = 11 : i64} {
  func.func @_head_kernel(%arg0: i32, %arg1: memref<2x1024xf32, #tpu.memory_space<vmem>>, %arg2: memref<1024x288xbf16, #tpu.memory_space<vmem>>, %arg3: memref<1x288xf32, #tpu.memory_space<vmem>>, %arg4: memref<288x64xbf16, #tpu.memory_space<vmem>>, %arg5: memref<1x64xf32, #tpu.memory_space<vmem>>, %arg6: memref<64x256xbf16, #tpu.memory_space<vmem>>, %arg7: memref<1x256xf32, #tpu.memory_space<vmem>>, %arg8: memref<256x7xbf16, #tpu.memory_space<vmem>>, %arg9: memref<1x7xf32, #tpu.memory_space<vmem>>, %arg10: memref<2x6xf32, #tpu.memory_space<vmem>>, %arg11: memref<2x6xf32, #tpu.memory_space<vmem>>, %arg12: memref<2x1xf32, #tpu.memory_space<vmem>>) attributes {dimension_semantics = [#tpu.dimension_semantics<arbitrary>], iteration_bounds = array<i64: 1>, scalar_prefetch = 0 : i64, scratch_operands = 0 : i64, tpu.core_type = #tpu.core_type<tc>, window_params = [{pipeline_mode = #tpu.pipeline_mode<synchronous>, transform_indices = @transform_0, window_bounds = array<i64: 2, 1024>}, {pipeline_mode = #tpu.pipeline_mode<synchronous>, transform_indices = @transform_1, window_bounds = array<i64: 1024, 288>}, {pipeline_mode = #tpu.pipeline_mode<synchronous>, transform_indices = @transform_2, window_bounds = array<i64: 1, 288>}, {pipeline_mode = #tpu.pipeline_mode<synchronous>, transform_indices = @transform_3, window_bounds = array<i64: 288, 64>}, {pipeline_mode = #tpu.pipeline_mode<synchronous>, transform_indices = @transform_4, window_bounds = array<i64: 1, 64>}, {pipeline_mode = #tpu.pipeline_mode<synchronous>, transform_indices = @transform_5, window_bounds = array<i64: 64, 256>}, {pipeline_mode = #tpu.pipeline_mode<synchronous>, transform_indices = @transform_6, window_bounds = array<i64: 1, 256>}, {pipeline_mode = #tpu.pipeline_mode<synchronous>, transform_indices = @transform_7, window_bounds = array<i64: 256, 7>}, {pipeline_mode = #tpu.pipeline_mode<synchronous>, transform_indices = @transform_8, window_bounds = array<i64: 1, 7>}, {pipeline_mode = #tpu.pipeline_mode<synchronous>, transform_indices = @transform_9, window_bounds = array<i64: 2, 6>}, {pipeline_mode = #tpu.pipeline_mode<synchronous>, transform_indices = @transform_10, window_bounds = array<i64: 2, 6>}, {pipeline_mode = #tpu.pipeline_mode<synchronous>, transform_indices = @transform_11, window_bounds = array<i64: 2, 1>}]} {
    %c0 = arith.constant 0 : index
    %c0_0 = arith.constant 0 : index
    %0 = vector.load %arg1[%c0, %c0_0] : memref<2x1024xf32, #tpu.memory_space<vmem>>, vector<2x1024xf32>
    %1 = arith.truncf %0 : vector<2x1024xf32> to vector<2x1024xbf16>
    %c0_1 = arith.constant 0 : index
    %c0_2 = arith.constant 0 : index
    %2 = vector.load %arg2[%c0_1, %c0_2] : memref<1024x288xbf16, #tpu.memory_space<vmem>>, vector<1024x288xbf16>
    %cst = arith.constant dense<0.000000e+00> : vector<2x288xf32>
    %3 = tpu.matmul %1, %2, %cst {dimension_numbers = #tpu.dot_dimension_numbers<[1], [0], [0], [1], [0, 0, 1, 1], [], []>} : vector<2x1024xbf16>, vector<1024x288xbf16>, vector<2x288xf32> -> vector<2x288xf32>
    %c0_3 = arith.constant 0 : index
    %c0_4 = arith.constant 0 : index
    %4 = vector.load %arg3[%c0_3, %c0_4] : memref<1x288xf32, #tpu.memory_space<vmem>>, vector<1x288xf32>
    %5 = vector.broadcast %4 : vector<1x288xf32> to vector<2x288xf32>
    %6 = arith.addf %3, %5 : vector<2x288xf32>
    %cst_5 = arith.constant 0.000000e+00 : f32
    %7 = vector.broadcast %cst_5 : f32 to vector<2x288xf32>
    %8 = arith.maximumf %6, %7 : vector<2x288xf32>
    %9 = arith.truncf %8 : vector<2x288xf32> to vector<2x288xbf16>
    %c0_6 = arith.constant 0 : index
    %c0_7 = arith.constant 0 : index
    %10 = vector.load %arg4[%c0_6, %c0_7] : memref<288x64xbf16, #tpu.memory_space<vmem>>, vector<288x64xbf16>
    %cst_8 = arith.constant dense<0.000000e+00> : vector<2x64xf32>
    %11 = tpu.matmul %9, %10, %cst_8 {dimension_numbers = #tpu.dot_dimension_numbers<[1], [0], [0], [1], [0, 0, 1, 1], [], []>} : vector<2x288xbf16>, vector<288x64xbf16>, vector<2x64xf32> -> vector<2x64xf32>
    %c0_9 = arith.constant 0 : index
    %c0_10 = arith.constant 0 : index
    %12 = vector.load %arg5[%c0_9, %c0_10] : memref<1x64xf32, #tpu.memory_space<vmem>>, vector<1x64xf32>
    %13 = vector.broadcast %12 : vector<1x64xf32> to vector<2x64xf32>
    %14 = arith.addf %11, %13 : vector<2x64xf32>
    %cst_11 = arith.constant 0.000000e+00 : f32
    %15 = vector.broadcast %cst_11 : f32 to vector<2x64xf32>
    %16 = arith.maximumf %14, %15 : vector<2x64xf32>
    %17 = arith.truncf %16 : vector<2x64xf32> to vector<2x64xbf16>
    %c0_12 = arith.constant 0 : index
    %c0_13 = arith.constant 0 : index
    %18 = vector.load %arg6[%c0_12, %c0_13] : memref<64x256xbf16, #tpu.memory_space<vmem>>, vector<64x256xbf16>
    %cst_14 = arith.constant dense<0.000000e+00> : vector<2x256xf32>
    %19 = tpu.matmul %17, %18, %cst_14 {dimension_numbers = #tpu.dot_dimension_numbers<[1], [0], [0], [1], [0, 0, 1, 1], [], []>} : vector<2x64xbf16>, vector<64x256xbf16>, vector<2x256xf32> -> vector<2x256xf32>
    %c0_15 = arith.constant 0 : index
    %c0_16 = arith.constant 0 : index
    %20 = vector.load %arg7[%c0_15, %c0_16] : memref<1x256xf32, #tpu.memory_space<vmem>>, vector<1x256xf32>
    %21 = vector.broadcast %20 : vector<1x256xf32> to vector<2x256xf32>
    %22 = arith.addf %19, %21 : vector<2x256xf32>
    %cst_17 = arith.constant 0.000000e+00 : f32
    %23 = vector.broadcast %cst_17 : f32 to vector<2x256xf32>
    %24 = arith.maximumf %22, %23 : vector<2x256xf32>
    %25 = arith.truncf %24 : vector<2x256xf32> to vector<2x256xbf16>
    %c0_18 = arith.constant 0 : index
    %c0_19 = arith.constant 0 : index
    %26 = vector.load %arg8[%c0_18, %c0_19] : memref<256x7xbf16, #tpu.memory_space<vmem>>, vector<256x7xbf16>
    %cst_20 = arith.constant dense<0.000000e+00> : vector<2x7xf32>
    %27 = tpu.matmul %25, %26, %cst_20 {dimension_numbers = #tpu.dot_dimension_numbers<[1], [0], [0], [1], [0, 0, 1, 1], [], []>} : vector<2x256xbf16>, vector<256x7xbf16>, vector<2x7xf32> -> vector<2x7xf32>
    %c0_21 = arith.constant 0 : index
    %c0_22 = arith.constant 0 : index
    %28 = vector.load %arg9[%c0_21, %c0_22] : memref<1x7xf32, #tpu.memory_space<vmem>>, vector<1x7xf32>
    %29 = vector.broadcast %28 : vector<1x7xf32> to vector<2x7xf32>
    %30 = arith.addf %27, %29 : vector<2x7xf32>
    %31 = vector.extract_strided_slice %30 {offsets = [0, 0], sizes = [2, 6], strides = [1, 1]} : vector<2x7xf32> to vector<2x6xf32>
    %32 = vector.extract_strided_slice %30 {offsets = [0, 6], sizes = [2, 1], strides = [1, 1]} : vector<2x7xf32> to vector<2x1xf32>
    %cst_23 = arith.constant dense<0xFF800000> : vector<2xf32>
    %33 = vector.multi_reduction <maximumf>, %31, %cst_23 [1] : vector<2x6xf32> to vector<2xf32>
    %34 = vector.shape_cast %33 : vector<2xf32> to vector<2x1xf32>
    %35 = vector.broadcast %34 : vector<2x1xf32> to vector<2x6xf32>
    %36 = arith.subf %31, %35 : vector<2x6xf32>
    %37 = math.exp %36 : vector<2x6xf32>
    %cst_24 = arith.constant dense<0.000000e+00> : vector<2xf32>
    %38 = vector.multi_reduction <add>, %37, %cst_24 [1] : vector<2x6xf32> to vector<2xf32>
    %39 = vector.shape_cast %38 : vector<2xf32> to vector<2x1xf32>
    %40 = math.log %39 : vector<2x1xf32>
    %c0_25 = arith.constant 0 : index
    %c0_26 = arith.constant 0 : index
    %41 = vector.load %arg10[%c0_25, %c0_26] : memref<2x6xf32, #tpu.memory_space<vmem>>, vector<2x6xf32>
    tpu.vector_store %arg10[%c0_25, %c0_26], %31 {strides = array<i32>} : memref<2x6xf32, #tpu.memory_space<vmem>>, vector<2x6xf32>,
    %42 = vector.broadcast %40 : vector<2x1xf32> to vector<2x6xf32>
    %43 = arith.subf %36, %42 : vector<2x6xf32>
    %c0_27 = arith.constant 0 : index
    %c0_28 = arith.constant 0 : index
    %44 = vector.load %arg11[%c0_27, %c0_28] : memref<2x6xf32, #tpu.memory_space<vmem>>, vector<2x6xf32>
    tpu.vector_store %arg11[%c0_27, %c0_28], %43 {strides = array<i32>} : memref<2x6xf32, #tpu.memory_space<vmem>>, vector<2x6xf32>,
    %c0_29 = arith.constant 0 : index
    %c0_30 = arith.constant 0 : index
    %45 = vector.load %arg12[%c0_29, %c0_30] : memref<2x1xf32, #tpu.memory_space<vmem>>, vector<2x1xf32>
    tpu.vector_store %arg12[%c0_29, %c0_30], %32 {strides = array<i32>} : memref<2x1xf32, #tpu.memory_space<vmem>>, vector<2x1xf32>,
    return
  }
  func.func @transform_0(%arg0: i32) -> (i32, i32) {
    %c0_i32 = arith.constant 0 : i32
    %c0_i32_0 = arith.constant 0 : i32
    %c0_i32_1 = arith.constant 0 : i32
    return %c0_i32, %c0_i32_0 : i32, i32
  }
  func.func @transform_1(%arg0: i32) -> (i32, i32) {
    %c0_i32 = arith.constant 0 : i32
    %c0_i32_0 = arith.constant 0 : i32
    %c0_i32_1 = arith.constant 0 : i32
    return %c0_i32, %c0_i32_0 : i32, i32
  }
  func.func @transform_2(%arg0: i32) -> (i32, i32) {
    %c0_i32 = arith.constant 0 : i32
    %c0_i32_0 = arith.constant 0 : i32
    %c0_i32_1 = arith.constant 0 : i32
    return %c0_i32, %c0_i32_0 : i32, i32
  }
  func.func @transform_3(%arg0: i32) -> (i32, i32) {
    %c0_i32 = arith.constant 0 : i32
    %c0_i32_0 = arith.constant 0 : i32
    %c0_i32_1 = arith.constant 0 : i32
    return %c0_i32, %c0_i32_0 : i32, i32
  }
  func.func @transform_4(%arg0: i32) -> (i32, i32) {
    %c0_i32 = arith.constant 0 : i32
    %c0_i32_0 = arith.constant 0 : i32
    %c0_i32_1 = arith.constant 0 : i32
    return %c0_i32, %c0_i32_0 : i32, i32
  }
  func.func @transform_5(%arg0: i32) -> (i32, i32) {
    %c0_i32 = arith.constant 0 : i32
    %c0_i32_0 = arith.constant 0 : i32
    %c0_i32_1 = arith.constant 0 : i32
    return %c0_i32, %c0_i32_0 : i32, i32
  }
  func.func @transform_6(%arg0: i32) -> (i32, i32) {
    %c0_i32 = arith.constant 0 : i32
    %c0_i32_0 = arith.constant 0 : i32
    %c0_i32_1 = arith.constant 0 : i32
    return %c0_i32, %c0_i32_0 : i32, i32
  }
  func.func @transform_7(%arg0: i32) -> (i32, i32) {
    %c0_i32 = arith.constant 0 : i32
    %c0_i32_0 = arith.constant 0 : i32
    %c0_i32_1 = arith.constant 0 : i32
    return %c0_i32, %c0_i32_0 : i32, i32
  }
  func.func @transform_8(%arg0: i32) -> (i32, i32) {
    %c0_i32 = arith.constant 0 : i32
    %c0_i32_0 = arith.constant 0 : i32
    %c0_i32_1 = arith.constant 0 : i32
    return %c0_i32, %c0_i32_0 : i32, i32
  }
  func.func @transform_9(%arg0: i32) -> (i32, i32) {
    %c0_i32 = arith.constant 0 : i32
    %c0_i32_0 = arith.constant 0 : i32
    %c0_i32_1 = arith.constant 0 : i32
    return %c0_i32, %c0_i32_0 : i32, i32
  }
  func.func @transform_10(%arg0: i32) -> (i32, i32) {
    %c0_i32 = arith.constant 0 : i32
    %c0_i32_0 = arith.constant 0 : i32
    %c0_i32_1 = arith.constant 0 : i32
    return %c0_i32, %c0_i32_0 : i32, i32
  }
  func.func @transform_11(%arg0: i32) -> (i32, i32) {
    %c0_i32 = arith.constant 0 : i32
    %c0_i32_0 = arith.constant 0 : i32
    %c0_i32_1 = arith.constant 0 : i32
    return %c0_i32, %c0_i32_0 : i32, i32
  }
}

</mosaic_0001>

<bundles_post_ra>
// kernel: agent_forward.2
= control target key start
LH: loop header
LB: loop body
LE: loop exit
PB: predicated region body
PF: predicated region fallthrough
CT: control target
= control target key end

     0   :  { %vm343_vm0 = vcmask 130048   ;;  %s726_s1 = inlined_call_operand.vmem [shape: bf16[256,16], index: 1, kind: input, shape index: {}]   ;;  %s727_s0 = inlined_call_operand.vmem [shape: f32[128,256], index: 0, kind: input, shape index: {}]   ;;  %s728_s2 = inlined_call_operand.vmem [shape: f32[1,16], index: 2, kind: input, shape index: {}]   ;;  %s729_s3 = inlined_call_operand.vmem [shape: f32[128,16], index: 3, kind: output, shape index: {}]  }
   0x1   :  { %v461_v0 = vld [vmem:[%s726_s1 + $0x78] sm:$0xff]   ;;  %v463_v2 = vld [vmem:[%s726_s1 + $0x70] sm:$0xff]   ;;  %v465_v4 = vld [vmem:[%s726_s1 + $0x68] sm:$0xff]  }
   0x2   :  { %v462_v1 = vld [vmem:[%s726_s1 + $0x38] sm:$0xff]   ;;  %381 = vmatprep.subr.bf16.mxu0 %v461_v0  ;;  %445 = vmatprep.subr.bf16.mxu1 %v461_v0  ;;  %v464_v3 = vld [vmem:[%s726_s1 + $0x30] sm:$0xff]   ;;  %v466_v5 = vld [vmem:[%s726_s1 + $0x28] sm:$0xff]  }
   0x3   :  { %382 = vmatpush3.bf16.msra.mxu0 %v462_v1  ;;  %453 = vmatpush3.bf16.msra.mxu1 %v462_v1  ;;  %v467_v6 = vld [vmem:[%s726_s1 + $0x60] sm:$0xff]   ;;  %v469_v8 = vld [vmem:[%s726_s1 + $0x58] sm:$0xff]   ;;  %v471_v10 = vld [vmem:[%s726_s1 + $0x50] sm:$0xff]  }
   0x4   :  { %383 = vmatprep.subr.bf16.mxu0 %v463_v2  ;;  %446 = vmatprep.subr.bf16.mxu1 %v463_v2  ;;  %v468_v7 = vld [vmem:[%s726_s1 + $0x20] sm:$0xff]   ;;  %v470_v9 = vld [vmem:[%s726_s1 + $0x18] sm:$0xff]   ;;  %v16_v11 = vld [vmem:[%s727_s0 + $0x8] sm:$0xff] }
   0x5   :  { %v18_v12 = vld [vmem:[%s727_s0 + $0x18] sm:$0xff]  ;;  %v32_v13 = vld [vmem:[%s727_s0 + $0x88] sm:$0xff]  ;;  %v48_v14 = vmul.f32 0.003921569, %v16_v11  ;;  %v472_v19 = vld [vmem:[%s726_s1 + $0x10] sm:$0xff]  }
   0x6   :  { %v50_v15 = vmul.f32 0.003921569, %v18_v12  ;;  %v34_v16 = vld [vmem:[%s727_s0 + $0x98] sm:$0xff]  ;;  %v64_v17 = vmul.f32 0.003921569, %v32_v13  ;;  %v473_v21 = vld [vmem:[%s726_s1 + $0x48] sm:$0xff]  }
   0x7   :  { %384 = vmatpush3.bf16.msra.mxu0 %v464_v3  ;;  %454 = vmatpush3.bf16.msra.mxu1 %v464_v3  ;;  %v66_v18 = vmul.f32 0.003921569, %v34_v16  ;;  %v474_v23 = vld [vmem:[%s726_s1 + $0x8] sm:$0xff]   ;;  %v475_v24 = vld [vmem:[%s726_s1 + $0x40] sm:$0xff]   ;;  %v17_v26 = vld [vmem:[%s727_s0 + $0x10] sm:$0xff] }
   0x8   :  { %385 = vmatprep.subr.bf16.mxu0 %v465_v4  ;;  %447 = vmatprep.subr.bf16.mxu1 %v465_v4  ;;  %v80_v20 = vpack.c.bf16 %v50_v15, %v48_v14  ;;  %v15_v25 = vld [vmem:[%s727_s0] sm:$0xff]  ;;  %v33_v28 = vld [vmem:[%s727_s0 + $0x90] sm:$0xff]  ;;  %v20_v29 = vld [vmem:[%s727_s0 + $0x28] sm:$0xff]  ;;  %v49_v35 = vmul.f32 0.003921569, %v17_v26 }
   0x9   :  { %v88_v22 = vpack.c.bf16 %v66_v18, %v64_v17  ;;  %v31_v27 = vld [vmem:[%s727_s0 + $0x80] sm:$0xff]  ;;  %v22_v30 = vld [vmem:[%s727_s0 + $0x38] sm:$0xff]  ;;  %v36_v31 = vld [vmem:[%s727_s0 + $0xa8] sm:$0xff]  ;;  %v47_v34 = vmul.f32 0.003921569, %v15_v25 }
   0xa   :  { %262 = vmatprep.mubr.bf16.mxu0 %v80_v20  ;;  %v38_v32 = vld [vmem:[%s727_s0 + $0xb8] sm:$0xff]  ;;  %v476_v33 = vld [vmem:[%s726_s1] sm:$0xff]   ;;  %v63_v36 = vmul.f32 0.003921569, %v31_v27  ;;  %v65_v37 = vmul.f32 0.003921569, %v33_v28 }
   0xb   :  { %386 = vmatpush3.bf16.msra.mxu0 %v466_v5  ;;  %455 = vmatpush3.bf16.msra.mxu1 %v466_v5  ;;  %v52_v38 = vmul.f32 0.003921569, %v20_v29  ;;  %v54_v39 = vmul.f32 0.003921569, %v22_v30  ;;  %v68_v40 = vmul.f32 0.003921569, %v36_v31  ;;  %v79_v42 = vpack.c.bf16 %v49_v35, %v47_v34 }
   0xc   :  { %387 = vmatprep.subr.bf16.mxu0 %v467_v6  ;;  %448 = vmatprep.subr.bf16.mxu1 %v467_v6  ;;  %v70_v41 = vmul.f32 0.003921569, %v38_v32  ;;  %v87_v43 = vpack.c.bf16 %v65_v37, %v63_v36  ;;  %v19_v44 = vld [vmem:[%s727_s0 + $0x20] sm:$0xff]  ;;  %v21_v45 = vld [vmem:[%s727_s0 + $0x30] sm:$0xff]  ;;  %v24_v50 = vld [vmem:[%s727_s0 + $0x48] sm:$0xff] }
   0xd   :  { %294 = vmatprep.mubr.bf16.mxu1 %v88_v22  ;;  %v82_v46 = vpack.c.bf16 %v54_v39, %v52_v38  ;;  %v35_v48 = vld [vmem:[%s727_s0 + $0xa0] sm:$0xff]  ;;  %v37_v49 = vld [vmem:[%s727_s0 + $0xb0] sm:$0xff]  ;;  %v26_v51 = vld [vmem:[%s727_s0 + $0x58] sm:$0xff]  ;;  %v51_v54 = vmul.f32 0.003921569, %v19_v44 }
   0xe   :  { %v90_v47 = vpack.c.bf16 %v70_v41, %v68_v40  ;;  %v40_v52 = vld [vmem:[%s727_s0 + $0xc8] sm:$0xff]  ;;  %v42_v53 = vld [vmem:[%s727_s0 + $0xd8] sm:$0xff]  ;;  %v53_v55 = vmul.f32 0.003921569, %v21_v45  ;;  %v67_v56 = vmul.f32 0.003921569, %v35_v48 }
   0xf   :  { %388 = vmatpush3.bf16.msra.mxu0 %v468_v7  ;;  %456 = vmatpush3.bf16.msra.mxu1 %v468_v7  ;;  %v69_v57 = vmul.f32 0.003921569, %v37_v49  ;;  %v56_v58 = vmul.f32 0.003921569, %v24_v50  ;;  %v58_v59 = vmul.f32 0.003921569, %v26_v51 }
  0x10   :  { %389 = vmatprep.subr.bf16.mxu0 %v469_v8  ;;  %449 = vmatprep.subr.bf16.mxu1 %v469_v8  ;;  %v72_v60 = vmul.f32 0.003921569, %v40_v52  ;;  %v74_v61 = vmul.f32 0.003921569, %v42_v53  ;;  %v81_v62 = vpack.c.bf16 %v53_v55, %v51_v54  ;;  %v23_v0 = vld [vmem:[%s727_s0 + $0x40] sm:$0xff]  ;;  %v25_v1 = vld [vmem:[%s727_s0 + $0x50] sm:$0xff] }
  0x11   :  { %v89_v63 = vpack.c.bf16 %v69_v57, %v67_v56  ;;  %v84_v2 = vpack.c.bf16 %v58_v59, %v56_v58  ;;  %v39_v4 = vld [vmem:[%s727_s0 + $0xc0] sm:$0xff]  ;;  %v41_v5 = vld [vmem:[%s727_s0 + $0xd0] sm:$0xff]  ;;  %v28_v6 = vld [vmem:[%s727_s0 + $0x68] sm:$0xff]  ;;  %v57_v11 = vmul.f32 0.003921569, %v25_v1 }
  0x12   :  { %v92_v3 = vpack.c.bf16 %v74_v61, %v72_v60  ;;  %v30_v7 = vld [vmem:[%s727_s0 + $0x78] sm:$0xff]  ;;  %v44_v8 = vld [vmem:[%s727_s0 + $0xe8] sm:$0xff]  ;;  %v71_v12 = vmul.f32 0.003921569, %v39_v4  ;;  %v73_v13 = vmul.f32 0.003921569, %v41_v5 }
  0x13   :  { %390 = vmatpush3.bf16.msra.mxu0 %v470_v9  ;;  %457 = vmatpush3.bf16.msra.mxu1 %v470_v9  ;;  %v46_v9 = vld [vmem:[%s727_s0 + $0xf8] sm:$0xff]  ;;  %v60_v14 = vmul.f32 0.003921569, %v28_v6  ;;  %v62_v15 = vmul.f32 0.003921569, %v30_v7  ;;  %v27_v20 = vld [vmem:[%s727_s0 + $0x60] sm:$0xff] }
  0x14   :  { %391 = vmatprep.subr.bf16.mxu0 %v471_v10  ;;  %450 = vmatprep.subr.bf16.mxu1 %v471_v10  ;;  %v55_v10 = vmul.f32 0.003921569, %v23_v0  ;;  %v76_v16 = vmul.f32 0.003921569, %v44_v8  ;;  %v78_v17 = vmul.f32 0.003921569, %v46_v9 }
  0x15   :  { %v45_v25 = vld [vmem:[%s727_s0 + $0xf0] sm:$0xff]  ;;  %v59_v26 = vmul.f32 0.003921569, %v27_v20  ;;  %v644_v34 = vld [vmem:[%s728_s2] ss:$0 sm:$0xff] }
  0x16   :  { %v83_v18 = vpack.c.bf16 %v57_v11, %v55_v10  ;;  %v94_v22 = vpack.c.bf16 %v78_v17, %v76_v16  ;;  %v77_v29 = vmul.f32 0.003921569, %v45_v25 }
  0x17   :  { %392 = vmatpush3.bf16.msra.mxu0 %v472_v19  ;;  %458 = vmatpush3.bf16.msra.mxu1 %v472_v19  ;;  %v91_v19 = vpack.c.bf16 %v73_v13, %v71_v12 }
  0x18   :  { %393 = vmatprep.subr.bf16.mxu0 %v473_v21  ;;  %451 = vmatprep.subr.bf16.mxu1 %v473_v21  ;;  %v86_v21 = vpack.c.bf16 %v62_v15, %v60_v14 }
  0x1b   :  { %394 = vmatpush3.bf16.msra.mxu0 %v474_v23  ;;  %459 = vmatpush3.bf16.msra.mxu1 %v474_v23  ;;  %v29_v23 = vld [vmem:[%s727_s0 + $0x70] sm:$0xff] }
  0x1c   :  { %395 = vmatprep.subr.bf16.mxu0 %v475_v24  ;;  %452 = vmatprep.subr.bf16.mxu1 %v475_v24  ;;  %v43_v24 = vld [vmem:[%s727_s0 + $0xe0] sm:$0xff]  ;;  %v61_v27 = vmul.f32 0.003921569, %v29_v23 }
  0x1d   :  { %v75_v28 = vmul.f32 0.003921569, %v43_v24 }
  0x1e   :  { %v85_v30 = vpack.c.bf16 %v61_v27, %v59_v26 }
  0x1f   :  { %396 = vmatpush3.bf16.msra.mxu0 %v476_v33  ;;  %460 = vmatpush3.bf16.msra.mxu1 %v476_v33  ;;  %v93_v31 = vpack.c.bf16 %v77_v29, %v75_v28 }
  0x22   :  { %263 = vmatmul.mubr.bf16.vlgmr.msra.gmra.mxu0 %v79_v42  ;;  %295 = vmatmul.mubr.bf16.vlgmr.msra.gmra.mxu1 %v87_v43 }
  0x23   :  { %270 = vmatprep.mubr.bf16.mxu0 %v82_v46  ;;  %302 = vmatprep.mubr.bf16.mxu1 %v90_v47 }
  0x2a   :  { %271 = vmatmul.mubr.bf16.gmra.mxu0 %v81_v62  ;;  %303 = vmatmul.mubr.bf16.gmra.mxu1 %v89_v63 }
  0x2b   :  { %278 = vmatprep.mubr.bf16.mxu0 %v84_v2  ;;  %310 = vmatprep.mubr.bf16.mxu1 %v92_v3 }
  0x32   :  { %279 = vmatmul.mubr.bf16.gmra.mxu0 %v83_v18  ;;  %311 = vmatmul.mubr.bf16.gmra.mxu1 %v91_v19 }
  0x33   :  { %286 = vmatprep.mubr.bf16.mxu0 %v86_v21  ;;  %318 = vmatprep.mubr.bf16.mxu1 %v94_v22 }
  0x3a   :  { %287 = vmatmul.mubr.bf16.gmra.mxu0 %v85_v30  ;;  %319 = vmatmul.mubr.bf16.gmra.mxu1 %v93_v31 }
  0xe2   :  { %v397_v32 = vpop.f32.mrf.mxu0  ;;  %v421_v33 = vpop.f32.mrf.mxu1 }
  0xe4   :  { %v398_v35 = vpop.f32.mrf.mxu0  ;;  %v422_v36 = vpop.f32.mrf.mxu1 }
  0xe5   :  { %v399_v37 = vadd.f32 %v398_v35, %v397_v32  ;;  %v423_v38 = vadd.f32 %v422_v36, %v421_v33 }
  0xe6   :  { %v400_v39 = vpop.f32.mrf.mxu0  ;;  %v424_v40 = vpop.f32.mrf.mxu1 }
  0xe7   :  { %v265_v41 = vadd.f32 %v399_v37, %v644_v34  ;;  %v297_v42 = vadd.f32 %v423_v38, %v644_v34 }
  0xe8   :  { %v401_v43 = vpop.f32.mrf.mxu0  ;;  %v425_v44 = vpop.f32.mrf.mxu1 }
  0xe9   :  { %v327_v45 = vmax.f32 %v265_v41, 0.0  ;;  %v335_v46 = vmax.f32 %v297_v42, 0.0  ;;  %v402_v47 = vadd.f32 %v401_v43, %v400_v39  ;;  %v426_v48 = vadd.f32 %v425_v44, %v424_v40 }
  0xea   :  { %v403_v49 = vpop.f32.mrf.mxu0  ;;  %v427_v50 = vpop.f32.mrf.mxu1 }
  0xeb   :  { %344 = vst.msk [vmem:[%s729_s3] sm:$0xff] %vm343_vm0, %v327_v45  ;;  %352 = vst.msk [vmem:[%s729_s3 + $0x40] sm:$0xff] %vm343_vm0, %v335_v46  ;;  %v268_v51 = vadd.f32 %v402_v47, %v644_v34  ;;  %v300_v52 = vadd.f32 %v426_v48, %v644_v34 }
  0xec   :  { %v404_v53 = vpop.f32.mrf.mxu0  ;;  %v428_v54 = vpop.f32.mrf.mxu1 }
  0xed   :  { %v328_v55 = vmax.f32 %v268_v51, 0.0  ;;  %v336_v56 = vmax.f32 %v300_v52, 0.0  ;;  %v405_v57 = vadd.f32 %v404_v53, %v403_v49  ;;  %v429_v58 = vadd.f32 %v428_v54, %v427_v50 }
  0xee   :  { %v406_v59 = vpop.f32.mrf.mxu0  ;;  %v430_v60 = vpop.f32.mrf.mxu1 }
  0xef   :  { %345 = vst.msk [vmem:[%s729_s3 + $0x8] sm:$0xff] %vm343_vm0, %v328_v55  ;;  %353 = vst.msk [vmem:[%s729_s3 + $0x48] sm:$0xff] %vm343_vm0, %v336_v56  ;;  %v273_v61 = vadd.f32 %v405_v57, %v644_v34  ;;  %v305_v62 = vadd.f32 %v429_v58, %v644_v34 }
  0xf0   :  { %v407_v63 = vpop.f32.mrf.mxu0  ;;  %v431_v0 = vpop.f32.mrf.mxu1 }
  0xf1   :  { %v329_v1 = vmax.f32 %v273_v61, 0.0  ;;  %v337_v2 = vmax.f32 %v305_v62, 0.0  ;;  %v408_v3 = vadd.f32 %v407_v63, %v406_v59  ;;  %v432_v4 = vadd.f32 %v431_v0, %v430_v60 }
  0xf2   :  { %v409_v5 = vpop.f32.mrf.mxu0  ;;  %v433_v6 = vpop.f32.mrf.mxu1 }
  0xf3   :  { %346 = vst.msk [vmem:[%s729_s3 + $0x10] sm:$0xff] %vm343_vm0, %v329_v1  ;;  %354 = vst.msk [vmem:[%s729_s3 + $0x50] sm:$0xff] %vm343_vm0, %v337_v2  ;;  %v276_v7 = vadd.f32 %v408_v3, %v644_v34  ;;  %v308_v8 = vadd.f32 %v432_v4, %v644_v34 }
  0xf4   :  { %v410_v9 = vpop.f32.mrf.mxu0  ;;  %v434_v10 = vpop.f32.mrf.mxu1 }
  0xf5   :  { %v330_v11 = vmax.f32 %v276_v7, 0.0  ;;  %v338_v12 = vmax.f32 %v308_v8, 0.0  ;;  %v411_v13 = vadd.f32 %v410_v9, %v409_v5  ;;  %v435_v14 = vadd.f32 %v434_v10, %v433_v6 }
  0xf6   :  { %v412_v15 = vpop.f32.mrf.mxu0  ;;  %v436_v16 = vpop.f32.mrf.mxu1 }
  0xf7   :  { %347 = vst.msk [vmem:[%s729_s3 + $0x18] sm:$0xff] %vm343_vm0, %v330_v11  ;;  %355 = vst.msk [vmem:[%s729_s3 + $0x58] sm:$0xff] %vm343_vm0, %v338_v12  ;;  %v281_v17 = vadd.f32 %v411_v13, %v644_v34  ;;  %v313_v18 = vadd.f32 %v435_v14, %v644_v34 }
  0xf8   :  { %v413_v19 = vpop.f32.mrf.mxu0  ;;  %v437_v20 = vpop.f32.mrf.mxu1 }
  0xf9   :  { %v331_v21 = vmax.f32 %v281_v17, 0.0  ;;  %v339_v22 = vmax.f32 %v313_v18, 0.0  ;;  %v414_v23 = vadd.f32 %v413_v19, %v412_v15  ;;  %v438_v24 = vadd.f32 %v437_v20, %v436_v16 }
  0xfa   :  { %v415_v25 = vpop.f32.mrf.mxu0  ;;  %v439_v26 = vpop.f32.mrf.mxu1 }
  0xfb   :  { %348 = vst.msk [vmem:[%s729_s3 + $0x20] sm:$0xff] %vm343_vm0, %v331_v21  ;;  %356 = vst.msk [vmem:[%s729_s3 + $0x60] sm:$0xff] %vm343_vm0, %v339_v22  ;;  %v284_v27 = vadd.f32 %v414_v23, %v644_v34  ;;  %v316_v28 = vadd.f32 %v438_v24, %v644_v34 }
  0xfc   :  { %v416_v29 = vpop.f32.mrf.mxu0  ;;  %v440_v30 = vpop.f32.mrf.mxu1 }
  0xfd   :  { %v332_v31 = vmax.f32 %v284_v27, 0.0  ;;  %v340_v32 = vmax.f32 %v316_v28, 0.0  ;;  %v417_v33 = vadd.f32 %v416_v29, %v415_v25  ;;  %v441_v35 = vadd.f32 %v440_v30, %v439_v26 }
  0xfe   :  { %v418_v36 = vpop.f32.mrf.mxu0  ;;  %v442_v37 = vpop.f32.mrf.mxu1 }
  0xff   :  { %349 = vst.msk [vmem:[%s729_s3 + $0x28] sm:$0xff] %vm343_vm0, %v332_v31  ;;  %357 = vst.msk [vmem:[%s729_s3 + $0x68] sm:$0xff] %vm343_vm0, %v340_v32  ;;  %v289_v38 = vadd.f32 %v417_v33, %v644_v34  ;;  %v321_v39 = vadd.f32 %v441_v35, %v644_v34 }
 0x100   :  { %v419_v40 = vpop.f32.mrf.mxu0  ;;  %v443_v41 = vpop.f32.mrf.mxu1 }
 0x101   :  { %v333_v42 = vmax.f32 %v289_v38, 0.0  ;;  %v341_v43 = vmax.f32 %v321_v39, 0.0  ;;  %v420_v44 = vadd.f32 %v419_v40, %v418_v36  ;;  %v444_v45 = vadd.f32 %v443_v41, %v442_v37 }
 0x103   :  { %350 = vst.msk [vmem:[%s729_s3 + $0x30] sm:$0xff] %vm343_vm0, %v333_v42  ;;  %358 = vst.msk [vmem:[%s729_s3 + $0x70] sm:$0xff] %vm343_vm0, %v341_v43  ;;  %v292_v46 = vadd.f32 %v420_v44, %v644_v34  ;;  %v324_v47 = vadd.f32 %v444_v45, %v644_v34 }
 0x105   :  { %v334_v48 = vmax.f32 %v292_v46, 0.0  ;;  %v342_v49 = vmax.f32 %v324_v47, 0.0 }
 0x107   :  { %351 = vst.msk [vmem:[%s729_s3 + $0x38] sm:$0xff] %vm343_vm0, %v334_v48  ;;  %359 = vst.msk [vmem:[%s729_s3 + $0x78] sm:$0xff] %vm343_vm0, %v342_v49 }

// kernel: agent_forward.3
= control target key start
LH: loop header
LB: loop body
LE: loop exit
PB: predicated region body
PF: predicated region fallthrough
CT: control target
= control target key end

     0   :  { %17 = vsyncpa [#allocation3], 0  ;;  %v3033_v36 = vmov 1983009808   ;;  %v46_v38 = vlaneseq  ;;  %s3897_s0 = inlined_call_operand.vmem [shape: f32[2,1024], index: 0, kind: input, shape index: {}]   ;;  %s3898_s1 = inlined_call_operand.vmem [shape: bf16[1024,288], index: 1, kind: input, shape index: {}]   ;;  %s3899_s2 = inlined_call_operand.vmem [shape: f32[1,288], index: 2, kind: input, shape index: {}]   ;;  %s3900_s3 = inlined_call_operand.vmem [shape: bf16[288,64], index: 3, kind: input, shape index: {}]   ;;  %s3901_s4 = inlined_call_operand.vmem [shape: f32[1,64], index: 4, kind: input, shape index: {}]   ;;  %s3902_s5 = inlined_call_operand.vmem [shape: bf16[64,256], index: 5, kind: input, shape index: {}]   ;;  %s3903_s6 = inlined_call_operand.vmem [shape: f32[1,256], index: 6, kind: input, shape index: {}]   ;;  %s3904_s7 = inlined_call_operand.vmem [shape: bf16[256,7], index: 7, kind: input, shape index: {}]   ;;  %s3905_s8 = inlined_call_operand.vmem [shape: f32[1,7], index: 8, kind: input, shape index: {}]   ;;  %s3906_s9 = inlined_call_operand.hbm [shape: f32[2,6], index: 9, kind: output, shape index: {0}]   ;;  %s3907_s10 = inlined_call_operand.hbm [shape: f32[2,6], index: 10, kind: output, shape index: {1}]   ;;  %s3908_s11 = inlined_call_operand.vmem [shape: f32[2,1], index: 11, kind: output, shape index: {2}]  }
   0x1   :  { %v2681_v0 = vld [vmem:[%s3898_s1 + $0xac] ss:$12 sps:$4 sm:$0xff]   ;;  %v2685_v2 = vld [vmem:[%s3898_s1 + $0xa8] ss:$12 sps:$4 sm:$0xff]   ;;  %v2691_v6 = vld [vmem:[%s3898_s1 + $0x90] ss:$12 sps:$4 sm:$0xff]   ;;  %v44_v37 = vunpack.c.l.s4 %v3033_v36 }
   0x2   :  { %v2683_v1 = vld [vmem:[%s3898_s1 + $0x22c] ss:$12 sps:$4 sm:$0xff]   ;;  %1389 = vmatprep.subr.bf16.mxu0 %v2681_v0  ;;  %v2686_v3 = vld [vmem:[%s3898_s1 + $0x228] ss:$12 sps:$4 sm:$0xff]   ;;  %v2692_v7 = vld [vmem:[%s3898_s1 + $0x210] ss:$12 sps:$4 sm:$0xff]  }
   0x3   :  { %1430 = vmatprep.subr.bf16.mxu1 %v2683_v1  ;;  %v2687_v4 = vld [vmem:[%s3898_s1 + $0x94] ss:$12 sps:$4 sm:$0xff]   ;;  %1390 = vmatpush1.bf16.msra.mxu0 %v2685_v2  ;;  %v2693_v8 = vld [vmem:[%s3898_s1 + $0x7c] ss:$12 sps:$4 sm:$0xff]   ;;  %v2697_v10 = vld [vmem:[%s3898_s1 + $0x78] ss:$12 sps:$4 sm:$0xff]   ;;  %v45_v42 = vunpack.c.0.s8 %v44_v37 }
   0x4   :  { %1431 = vmatpush1.bf16.msra.mxu1 %v2686_v3  ;;  %v2689_v5 = vld [vmem:[%s3898_s1 + $0x214] ss:$12 sps:$4 sm:$0xff]   ;;  %1391 = vmatprep.subr.bf16.mxu0 %v2687_v4  ;;  %v2695_v9 = vld [vmem:[%s3898_s1 + $0x1fc] ss:$12 sps:$4 sm:$0xff]   ;;  %v2698_v11 = vld [vmem:[%s3898_s1 + $0x1f8] ss:$12 sps:$4 sm:$0xff]  }
   0x5   :  { %1432 = vmatprep.subr.bf16.mxu1 %v2689_v5  ;;  %v2699_v12 = vld [vmem:[%s3898_s1 + $0x64] ss:$12 sps:$4 sm:$0xff]   ;;  %v2703_v14 = vld [vmem:[%s3898_s1 + $0x60] ss:$12 sps:$4 sm:$0xff]   ;;  %v2709_v18 = vld [vmem:[%s3898_s1 + $0x48] ss:$12 sps:$4 sm:$0xff]  }
   0x6   :  { %v2701_v13 = vld [vmem:[%s3898_s1 + $0x1e4] ss:$12 sps:$4 sm:$0xff]   ;;  %v2704_v15 = vld [vmem:[%s3898_s1 + $0x1e0] ss:$12 sps:$4 sm:$0xff]   ;;  %v2710_v19 = vld [vmem:[%s3898_s1 + $0x1c8] ss:$12 sps:$4 sm:$0xff]  }
   0x7   :  { %1392 = vmatpush1.bf16.msra.mxu0 %v2691_v6  ;;  %v2705_v16 = vld [vmem:[%s3898_s1 + $0x4c] ss:$12 sps:$4 sm:$0xff]   ;;  %v2711_v20 = vld [vmem:[%s3898_s1 + $0x34] ss:$12 sps:$4 sm:$0xff]   ;;  %v2715_v22 = vld [vmem:[%s3898_s1 + $0x30] ss:$12 sps:$4 sm:$0xff]  }
   0x8   :  { %1433 = vmatpush1.bf16.msra.mxu1 %v2692_v7  ;;  %1393 = vmatprep.subr.bf16.mxu0 %v2693_v8  ;;  %v2707_v17 = vld [vmem:[%s3898_s1 + $0x1cc] ss:$12 sps:$4 sm:$0xff]   ;;  %v2713_v21 = vld [vmem:[%s3898_s1 + $0x1b4] ss:$12 sps:$4 sm:$0xff]   ;;  %v2716_v23 = vld [vmem:[%s3898_s1 + $0x1b0] ss:$12 sps:$4 sm:$0xff]  }
   0x9   :  { %1434 = vmatprep.subr.bf16.mxu1 %v2695_v9  ;;  %v2717_v24 = vld [vmem:[%s3898_s1 + $0x1c] ss:$12 sps:$4 sm:$0xff]   ;;  %v2721_v26 = vld [vmem:[%s3898_s1 + $0x18] ss:$12 sps:$4 sm:$0xff]   ;;  %v2727_v30 = vld [vmem:[%s3898_s1] ss:$12 sps:$4 sm:$0xff]  }
   0xa   :  { %v2719_v25 = vld [vmem:[%s3898_s1 + $0x19c] ss:$12 sps:$4 sm:$0xff]   ;;  %v2722_v27 = vld [vmem:[%s3898_s1 + $0x198] ss:$12 sps:$4 sm:$0xff]   ;;  %v2728_v31 = vld [vmem:[%s3898_s1 + $0x180] ss:$12 sps:$4 sm:$0xff]  }
   0xb   :  { %1394 = vmatpush1.bf16.msra.mxu0 %v2697_v10  ;;  %v2723_v28 = vld [vmem:[%s3898_s1 + $0x4] ss:$12 sps:$4 sm:$0xff]   ;;  %v2729_v32 = vld [vmem:[%s3898_s1 + $0x16c] ss:$12 sps:$4 sm:$0xff]   ;;  %v2733_v34 = vld [vmem:[%s3898_s1 + $0x168] ss:$12 sps:$4 sm:$0xff]  }
   0xc   :  { %1435 = vmatpush1.bf16.msra.mxu1 %v2698_v11  ;;  %1395 = vmatprep.subr.bf16.mxu0 %v2699_v12  ;;  %v2725_v29 = vld [vmem:[%s3898_s1 + $0x184] ss:$12 sps:$4 sm:$0xff]   ;;  %v2731_v33 = vld [vmem:[%s3898_s1 + $0x2ec] ss:$12 sps:$4 sm:$0xff]   ;;  %v2734_v35 = vld [vmem:[%s3898_s1 + $0x2e8] ss:$12 sps:$4 sm:$0xff]  }
   0xd   :  { %1436 = vmatprep.subr.bf16.mxu1 %v2701_v13  ;;  %v2735_v39 = vld [vmem:[%s3898_s1 + $0x154] ss:$12 sps:$4 sm:$0xff]   ;;  %v2739_v41 = vld [vmem:[%s3898_s1 + $0x150] ss:$12 sps:$4 sm:$0xff]   ;;  %v3217_v43 = vshrl.u32 %v46_v38, 7 }
   0xe   :  { %v2737_v40 = vld [vmem:[%s3898_s1 + $0x2d4] ss:$12 sps:$4 sm:$0xff]   ;;  %v2740_v44 = vld [vmem:[%s3898_s1 + $0x2d0] ss:$12 sps:$4 sm:$0xff]   ;;  %v2745_v47 = vld [vmem:[%s3898_s1 + $0x138] ss:$12 sps:$4 sm:$0xff]  }
   0xf   :  { %1396 = vmatpush1.bf16.msra.mxu0 %v2703_v14  ;;  %v2741_v45 = vld [vmem:[%s3898_s1 + $0x13c] ss:$12 sps:$4 sm:$0xff]   ;;  %v2746_v48 = vld [vmem:[%s3898_s1 + $0x2b8] ss:$12 sps:$4 sm:$0xff]   ;;  %v3235_v49 = vsub.s32 %v45_v42, %v3217_v43  ;;  %v2751_v53 = vld [vmem:[%s3898_s1 + $0x120] ss:$12 sps:$4 sm:$0xff]  }
  0x10   :  { %1437 = vmatpush1.bf16.msra.mxu1 %v2704_v15  ;;  %1397 = vmatprep.subr.bf16.mxu0 %v2705_v16  ;;  %v2743_v46 = vld [vmem:[%s3898_s1 + $0x2bc] ss:$12 sps:$4 sm:$0xff]   ;;  %v2747_v50 = vld [vmem:[%s3898_s1 + $0x124] ss:$12 sps:$4 sm:$0xff]   ;;  %v2752_v56 = vld [vmem:[%s3898_s1 + $0x2a0] ss:$12 sps:$4 sm:$0xff]  }
  0x11   :  { %1438 = vmatprep.subr.bf16.mxu1 %v2707_v17  ;;  %v2749_v51 = vld [vmem:[%s3898_s1 + $0x2a4] ss:$12 sps:$4 sm:$0xff]   ;;  %v2753_v57 = vld [vmem:[%s3898_s1 + $0x10c] ss:$12 sps:$4 sm:$0xff]   ;;  %v2757_v61 = vld [vmem:[%s3898_s1 + $0x108] ss:$12 sps:$4 sm:$0xff]  }
  0x12   :  { %v38_v52 = vld [vmem:[%s3897_s0] sm:$0xff]  ;;  %v2755_v58 = vld [vmem:[%s3898_s1 + $0x28c] ss:$12 sps:$4 sm:$0xff]   ;;  %v2758_v0 = vld [vmem:[%s3898_s1 + $0x288] ss:$12 sps:$4 sm:$0xff]  }
  0x13   :  { %1398 = vmatpush1.bf16.msra.mxu0 %v2709_v18  ;;  %v49_v54 = vrot.slane %v38_v52, %v3235_v49  ;;  %v42_v55 = vcombine.high %v38_v52, %v38_v52  ;;  %v2759_v1 = vld [vmem:[%s3898_s1 + $0xf4] ss:$12 sps:$4 sm:$0xff]   ;;  %v2763_v4 = vld [vmem:[%s3898_s1 + $0xf0] ss:$12 sps:$4 sm:$0xff]   ;;  %v2769_v8 = vld [vmem:[%s3898_s1 + $0xd8] ss:$12 sps:$4 sm:$0xff]  }
  0x14   :  { %1439 = vmatpush1.bf16.msra.mxu1 %v2710_v19  ;;  %1399 = vmatprep.subr.bf16.mxu0 %v2711_v20  ;;  %v2761_v2 = vld [vmem:[%s3898_s1 + $0x274] ss:$12 sps:$4 sm:$0xff]   ;;  %v2764_v5 = vld [vmem:[%s3898_s1 + $0x270] ss:$12 sps:$4 sm:$0xff]   ;;  %v2770_v9 = vld [vmem:[%s3898_s1 + $0x258] ss:$12 sps:$4 sm:$0xff]  }
  0x15   :  { %1440 = vmatprep.subr.bf16.mxu1 %v2713_v21  ;;  %v57_v59 = vcombine.high %v49_v54, %v49_v54  ;;  %v56_v60 = vrot.slane %v42_v55, %v3235_v49  ;;  %v2765_v6 = vld [vmem:[%s3898_s1 + $0xdc] ss:$12 sps:$4 sm:$0xff]   ;;  %v2771_v10 = vld [vmem:[%s3898_s1 + $0xc4] ss:$12 sps:$4 sm:$0xff]   ;;  %v2775_v12 = vld [vmem:[%s3898_s1 + $0xc0] ss:$12 sps:$4 sm:$0xff]   ;;  %v3314_v16 = vpack.c.bf16 %v49_v54, %v49_v54 }
  0x16   :  { %v2767_v7 = vld [vmem:[%s3898_s1 + $0x25c] ss:$12 sps:$4 sm:$0xff]   ;;  %v2773_v11 = vld [vmem:[%s3898_s1 + $0x244] ss:$12 sps:$4 sm:$0xff]   ;;  %v2776_v13 = vld [vmem:[%s3898_s1 + $0x240] ss:$12 sps:$4 sm:$0xff]  }
  0x17   :  { %1400 = vmatpush1.bf16.msra.mxu0 %v2715_v22  ;;  %v3263_v62 = vpack.c.bf16 %v57_v59, %v57_v59  ;;  %v58_v63 = vcombine.high %v56_v60, %v56_v60  ;;  %v2780_v14 = vld [vmem:[%s3898_s1 + $0x3ac] ss:$12 sps:$4 sm:$0xff]   ;;  %v3316_v17 = vpack.c.bf16 %v56_v60, %v56_v60  ;;  %v2778_v18 = vld [vmem:[%s3898_s1 + $0x3a8] ss:$12 sps:$4 sm:$0xff]   ;;  %v2784_v22 = vld [vmem:[%s3898_s1 + $0x390] ss:$12 sps:$4 sm:$0xff]  }
  0x18   :  { %1441 = vmatpush1.bf16.msra.mxu1 %v2716_v23  ;;  %1401 = vmatprep.subr.bf16.mxu0 %v2717_v24  ;;  %v2783_v15 = vld [vmem:[%s3898_s1 + $0x52c] ss:$12 sps:$4 sm:$0xff]   ;;  %v2781_v19 = vld [vmem:[%s3898_s1 + $0x528] ss:$12 sps:$4 sm:$0xff]   ;;  %v2787_v23 = vld [vmem:[%s3898_s1 + $0x510] ss:$12 sps:$4 sm:$0xff]  }
  0x19   :  { %1442 = vmatprep.subr.bf16.mxu1 %v2719_v25  ;;  %v3274_v3 = vpack.c.bf16 %v58_v63, %v58_v63  ;;  %1421 = vmatprep.mubr.bf16.mxu0 %v3263_v62  ;;  %v2786_v20 = vld [vmem:[%s3898_s1 + $0x394] ss:$12 sps:$4 sm:$0xff]   ;;  %v2792_v24 = vld [vmem:[%s3898_s1 + $0x37c] ss:$12 sps:$4 sm:$0xff]   ;;  %v2825_v52 = vld [vmem:[%s3898_s1 + $0x484] ss:$12 sps:$4 sm:$0xff]  }
  0x1a   :  { %v2789_v21 = vld [vmem:[%s3898_s1 + $0x514] ss:$12 sps:$4 sm:$0xff]   ;;  %v2795_v25 = vld [vmem:[%s3898_s1 + $0x4fc] ss:$12 sps:$4 sm:$0xff]  }
  0x1b   :  { %1402 = vmatpush1.bf16.msra.mxu0 %v2721_v26  ;;  %1462 = vmatprep.mubr.bf16.mxu1 %v3274_v3  ;;  %v2790_v26 = vld [vmem:[%s3898_s1 + $0x378] ss:$12 sps:$4 sm:$0xff]   ;;  %v2810_v36 = vld [vmem:[%s3898_s1 + $0x334] ss:$12 sps:$4 sm:$0xff]   ;;  %v2808_v38 = vld [vmem:[%s3898_s1 + $0x330] ss:$12 sps:$4 sm:$0xff]  }
  0x1c   :  { %1443 = vmatpush1.bf16.msra.mxu1 %v2722_v27  ;;  %1403 = vmatprep.subr.bf16.mxu0 %v2723_v28  ;;  %v2793_v27 = vld [vmem:[%s3898_s1 + $0x4f8] ss:$12 sps:$4 sm:$0xff]   ;;  %v2813_v37 = vld [vmem:[%s3898_s1 + $0x4b4] ss:$12 sps:$4 sm:$0xff]   ;;  %v39_v42 = vld [vmem:[%s3897_s0 + $0x8] sm:$0xff] }
  0x1d   :  { %1444 = vmatprep.subr.bf16.mxu1 %v2725_v29  ;;  %v2798_v28 = vld [vmem:[%s3898_s1 + $0x364] ss:$12 sps:$4 sm:$0xff]   ;;  %v2826_v59 = vld [vmem:[%s3898_s1 + $0x468] ss:$12 sps:$4 sm:$0xff]  }
  0x1e   :  { %v2801_v29 = vld [vmem:[%s3898_s1 + $0x4e4] ss:$12 sps:$4 sm:$0xff]   ;;  %v2829_v60 = vld [vmem:[%s3898_s1 + $0x5e8] ss:$12 sps:$4 sm:$0xff]  }
  0x1f   :  { %1404 = vmatpush1.bf16.msra.mxu0 %v2727_v30  ;;  %v2796_v30 = vld [vmem:[%s3898_s1 + $0x360] ss:$12 sps:$4 sm:$0xff]  }
  0x20   :  { %1445 = vmatpush1.bf16.msra.mxu1 %v2728_v31  ;;  %1405 = vmatprep.subr.bf16.mxu0 %v2729_v32  ;;  %v2799_v31 = vld [vmem:[%s3898_s1 + $0x4e0] ss:$12 sps:$4 sm:$0xff]  }
  0x21   :  { %1446 = vmatprep.subr.bf16.mxu1 %v2731_v33  ;;  %v2804_v32 = vld [vmem:[%s3898_s1 + $0x34c] ss:$12 sps:$4 sm:$0xff]   ;;  %v2837_v63 = vld [vmem:[%s3898_s1 + $0x5d4] ss:$12 sps:$4 sm:$0xff]  }
  0x22   :  { %v2807_v33 = vld [vmem:[%s3898_s1 + $0x4cc] ss:$12 sps:$4 sm:$0xff]  }
  0x23   :  { %1406 = vmatpush2.bf16.msra.mxu0 %v2733_v34  ;;  %v2802_v34 = vld [vmem:[%s3898_s1 + $0x348] ss:$12 sps:$4 sm:$0xff]  }
  0x24   :  { %1447 = vmatpush2.bf16.msra.mxu1 %v2734_v35  ;;  %1407 = vmatprep.subr.bf16.mxu0 %v2735_v39  ;;  %v2805_v35 = vld [vmem:[%s3898_s1 + $0x4c8] ss:$12 sps:$4 sm:$0xff]   ;;  %v2811_v39 = vld [vmem:[%s3898_s1 + $0x4b0] ss:$12 sps:$4 sm:$0xff]  }
  0x25   :  { %1448 = vmatprep.subr.bf16.mxu1 %v2737_v40  ;;  %v2816_v40 = vld [vmem:[%s3898_s1 + $0x31c] ss:$12 sps:$4 sm:$0xff]  }
  0x27   :  { %1408 = vmatpush2.bf16.msra.mxu0 %v2739_v41  ;;  %v2819_v41 = vld [vmem:[%s3898_s1 + $0x49c] ss:$12 sps:$4 sm:$0xff]  }
  0x28   :  { %1449 = vmatpush2.bf16.msra.mxu1 %v2740_v44  ;;  %1409 = vmatprep.subr.bf16.mxu0 %v2741_v45  ;;  %v2814_v44 = vld [vmem:[%s3898_s1 + $0x318] ss:$12 sps:$4 sm:$0xff]   ;;  %v3399_v45 = vrot.slane %v39_v42, %v3235_v49 }
  0x29   :  { %1450 = vmatprep.subr.bf16.mxu1 %v2743_v46  ;;  %v59_v46 = vcombine.high %v39_v42, %v39_v42  ;;  %v2886_v42 = vld [vmem:[%s3898_s1 + $0x200] ss:$12 sps:$4 sm:$0xff]  }
  0x2b   :  { %1410 = vmatpush2.bf16.msra.mxu0 %v2745_v47  ;;  %v2817_v47 = vld [vmem:[%s3898_s1 + $0x498] ss:$12 sps:$4 sm:$0xff]  }
  0x2c   :  { %1451 = vmatpush2.bf16.msra.mxu1 %v2746_v48  ;;  %1411 = vmatprep.subr.bf16.mxu0 %v2747_v50  ;;  %v2822_v48 = vld [vmem:[%s3898_s1 + $0x304] ss:$12 sps:$4 sm:$0xff]   ;;  %v74_v50 = vcombine.high %v3399_v45, %v3399_v45 }
  0x2d   :  { %1452 = vmatprep.subr.bf16.mxu1 %v2749_v51  ;;  %v3410_v51 = vrot.slane %v59_v46, %v3235_v49  ;;  %v2823_v49 = vld [vmem:[%s3898_s1 + $0x480] ss:$12 sps:$4 sm:$0xff]   ;;  %v2891_v46 = vld [vmem:[%s3898_s1 + $0x110] ss:$12 sps:$4 sm:$0xff]  }
  0x2e   :  { %v3418_v54 = vpack.c.bf16 %v74_v50, %v74_v50  ;;  %v2894_v50 = vld [vmem:[%s3898_s1 + $0x1d0] ss:$12 sps:$4 sm:$0xff]  }
  0x2f   :  { %1412 = vmatpush2.bf16.msra.mxu0 %v2751_v53  ;;  %v2820_v53 = vld [vmem:[%s3898_s1 + $0x300] ss:$12 sps:$4 sm:$0xff]   ;;  %v75_v55 = vcombine.high %v3410_v51, %v3410_v51 }
  0x30   :  { %1453 = vmatpush2.bf16.msra.mxu1 %v2752_v56  ;;  %1413 = vmatprep.subr.bf16.mxu0 %v2753_v57  ;;  %v2828_v56 = vld [vmem:[%s3898_s1 + $0x46c] ss:$12 sps:$4 sm:$0xff]  }
  0x31   :  { %1454 = vmatprep.subr.bf16.mxu1 %v2755_v58  ;;  %v3428_v57 = vpack.c.bf16 %v75_v55, %v75_v55  ;;  %v2831_v58 = vld [vmem:[%s3898_s1 + $0x5ec] ss:$12 sps:$4 sm:$0xff]  }
  0x32   :  { %v2898_v55 = vld [vmem:[%s3898_s1 + $0x1b8] ss:$12 sps:$4 sm:$0xff]  }
  0x33   :  { %1414 = vmatpush2.bf16.msra.mxu0 %v2757_v61  ;;  %v2834_v61 = vld [vmem:[%s3898_s1 + $0x454] ss:$12 sps:$4 sm:$0xff]  }
  0x34   :  { %1455 = vmatpush2.bf16.msra.mxu1 %v2758_v0  ;;  %1415 = vmatprep.subr.bf16.mxu0 %v2759_v1  ;;  %v2832_v0 = vld [vmem:[%s3898_s1 + $0x450] ss:$12 sps:$4 sm:$0xff]  }
  0x35   :  { %1456 = vmatprep.subr.bf16.mxu1 %v2761_v2  ;;  %v2835_v1 = vld [vmem:[%s3898_s1 + $0x5d0] ss:$12 sps:$4 sm:$0xff]  }
  0x36   :  { %v2840_v2 = vld [vmem:[%s3898_s1 + $0x43c] ss:$12 sps:$4 sm:$0xff]  }
  0x37   :  { %1416 = vmatpush2.bf16.msra.mxu0 %v2763_v4  ;;  %v2843_v4 = vld [vmem:[%s3898_s1 + $0x5bc] ss:$12 sps:$4 sm:$0xff]  }
  0x38   :  { %1457 = vmatpush2.bf16.msra.mxu1 %v2764_v5  ;;  %1417 = vmatprep.subr.bf16.mxu0 %v2765_v6  ;;  %v2838_v5 = vld [vmem:[%s3898_s1 + $0x438] ss:$12 sps:$4 sm:$0xff]  }
  0x39   :  { %1458 = vmatprep.subr.bf16.mxu1 %v2767_v7  ;;  %v2841_v6 = vld [vmem:[%s3898_s1 + $0x5b8] ss:$12 sps:$4 sm:$0xff]  }
  0x3a   :  { %v2846_v7 = vld [vmem:[%s3898_s1 + $0x424] ss:$12 sps:$4 sm:$0xff]  }
  0x3b   :  { %1418 = vmatpush2.bf16.msra.mxu0 %v2769_v8  ;;  %v2849_v8 = vld [vmem:[%s3898_s1 + $0x5a4] ss:$12 sps:$4 sm:$0xff]  }
  0x3c   :  { %1459 = vmatpush2.bf16.msra.mxu1 %v2770_v9  ;;  %1419 = vmatprep.subr.bf16.mxu0 %v2771_v10  ;;  %v2844_v9 = vld [vmem:[%s3898_s1 + $0x420] ss:$12 sps:$4 sm:$0xff]  }
  0x3d   :  { %1460 = vmatprep.subr.bf16.mxu1 %v2773_v11  ;;  %v2847_v10 = vld [vmem:[%s3898_s1 + $0x5a0] ss:$12 sps:$4 sm:$0xff]  }
  0x3e   :  { %v2852_v11 = vld [vmem:[%s3898_s1 + $0x40c] ss:$12 sps:$4 sm:$0xff]  }
  0x3f   :  { %1420 = vmatpush2.bf16.msra.mxu0 %v2775_v12  ;;  %v2855_v12 = vld [vmem:[%s3898_s1 + $0x58c] ss:$12 sps:$4 sm:$0xff]  }
  0x40   :  { %1461 = vmatpush2.bf16.msra.mxu1 %v2776_v13  ;;  %1471 = vmatprep.subr.bf16.mxu0 %v2780_v14  ;;  %v2850_v13 = vld [vmem:[%s3898_s1 + $0x408] ss:$12 sps:$4 sm:$0xff]  }
  0x41   :  { %1512 = vmatprep.subr.bf16.mxu1 %v2783_v15  ;;  %v2853_v14 = vld [vmem:[%s3898_s1 + $0x588] ss:$12 sps:$4 sm:$0xff]  }
  0x42   :  { %1422 = vmatmul.mubr.bf16.vlgmr.msra.gmra.mxu0 %v3314_v16  ;;  %v2858_v15 = vld [vmem:[%s3898_s1 + $0x3f4] ss:$12 sps:$4 sm:$0xff]  }
  0x43   :  { %1463 = vmatmul.mubr.bf16.vlgmr.msra.gmra.mxu1 %v3316_v17  ;;  %1472 = vmatpush1.bf16.msra.mxu0 %v2778_v18  ;;  %v2861_v18 = vld [vmem:[%s3898_s1 + $0x574] ss:$12 sps:$4 sm:$0xff]  }
  0x44   :  { %1513 = vmatpush1.bf16.msra.mxu1 %v2781_v19  ;;  %1473 = vmatprep.subr.bf16.mxu0 %v2786_v20  ;;  %v2856_v19 = vld [vmem:[%s3898_s1 + $0x3f0] ss:$12 sps:$4 sm:$0xff]  }
  0x45   :  { %1514 = vmatprep.subr.bf16.mxu1 %v2789_v21  ;;  %1503 = vmatprep.mubr.bf16.mxu0 %v3418_v54  ;;  %v2859_v20 = vld [vmem:[%s3898_s1 + $0x570] ss:$12 sps:$4 sm:$0xff]  }
  0x46   :  { %1544 = vmatprep.mubr.bf16.mxu1 %v3428_v57  ;;  %v2864_v21 = vld [vmem:[%s3898_s1 + $0x3dc] ss:$12 sps:$4 sm:$0xff]  }
  0x47   :  { %1474 = vmatpush1.bf16.msra.mxu0 %v2784_v22  ;;  %v2867_v22 = vld [vmem:[%s3898_s1 + $0x55c] ss:$12 sps:$4 sm:$0xff]  }
  0x48   :  { %1515 = vmatpush1.bf16.msra.mxu1 %v2787_v23  ;;  %1475 = vmatprep.subr.bf16.mxu0 %v2792_v24  ;;  %v2862_v23 = vld [vmem:[%s3898_s1 + $0x3d8] ss:$12 sps:$4 sm:$0xff]  }
  0x49   :  { %1516 = vmatprep.subr.bf16.mxu1 %v2795_v25  ;;  %v2865_v24 = vld [vmem:[%s3898_s1 + $0x558] ss:$12 sps:$4 sm:$0xff]  }
  0x4a   :  { %v2870_v25 = vld [vmem:[%s3898_s1 + $0x3c4] ss:$12 sps:$4 sm:$0xff]  }
  0x4b   :  { %1476 = vmatpush1.bf16.msra.mxu0 %v2790_v26  ;;  %v2873_v26 = vld [vmem:[%s3898_s1 + $0x544] ss:$12 sps:$4 sm:$0xff]  }
  0x4c   :  { %1517 = vmatpush1.bf16.msra.mxu1 %v2793_v27  ;;  %1477 = vmatprep.subr.bf16.mxu0 %v2798_v28  ;;  %v2868_v27 = vld [vmem:[%s3898_s1 + $0x3c0] ss:$12 sps:$4 sm:$0xff]  }
  0x4d   :  { %1518 = vmatprep.subr.bf16.mxu1 %v2801_v29  ;;  %v2871_v28 = vld [vmem:[%s3898_s1 + $0x540] ss:$12 sps:$4 sm:$0xff]   ;;  %v2875_v29 = vld [vmem:[%s3898_s1 + $0x170] ss:$12 sps:$4 sm:$0xff]  }
  0x4f   :  { %1478 = vmatpush1.bf16.msra.mxu0 %v2796_v30  ;;  %v2876_v30 = vld [vmem:[%s3898_s1 + $0x2f0] ss:$12 sps:$4 sm:$0xff]  }
  0x50   :  { %1519 = vmatpush1.bf16.msra.mxu1 %v2799_v31  ;;  %1479 = vmatprep.subr.bf16.mxu0 %v2804_v32  ;;  %v2877_v31 = vld [vmem:[%s3898_s1 + $0xb0] ss:$12 sps:$4 sm:$0xff]   ;;  %v3536_v32 = vpack.c.bf16 %v3399_v45, %v3399_v45  ;;  %v2888_v45 = vld [vmem:[%s3898_s1 + $0x2a8] ss:$12 sps:$4 sm:$0xff]  }
  0x51   :  { %1520 = vmatprep.subr.bf16.mxu1 %v2807_v33  ;;  %v3540_v33 = vpack.c.bf16 %v3410_v51, %v3410_v51  ;;  %v2895_v51 = vld [vmem:[%s3898_s1 + $0xf8] ss:$12 sps:$4 sm:$0xff]  }
  0x53   :  { %1480 = vmatpush1.bf16.msra.mxu0 %v2802_v34  ;;  %v2878_v34 = vld [vmem:[%s3898_s1 + $0x230] ss:$12 sps:$4 sm:$0xff]  }
  0x54   :  { %1521 = vmatpush1.bf16.msra.mxu1 %v2805_v35  ;;  %1481 = vmatprep.subr.bf16.mxu0 %v2810_v36  ;;  %v2879_v35 = vld [vmem:[%s3898_s1 + $0x158] ss:$12 sps:$4 sm:$0xff]  }
  0x55   :  { %1522 = vmatprep.subr.bf16.mxu1 %v2813_v37  ;;  %v2880_v36 = vld [vmem:[%s3898_s1 + $0x2d8] ss:$12 sps:$4 sm:$0xff]  }
  0x56   :  { %v2881_v37 = vld [vmem:[%s3898_s1 + $0x98] ss:$12 sps:$4 sm:$0xff]  }
  0x57   :  { %1482 = vmatpush1.bf16.msra.mxu0 %v2808_v38  ;;  %v2882_v38 = vld [vmem:[%s3898_s1 + $0x218] ss:$12 sps:$4 sm:$0xff]  }
  0x58   :  { %1523 = vmatpush1.bf16.msra.mxu1 %v2811_v39  ;;  %1483 = vmatprep.subr.bf16.mxu0 %v2816_v40  ;;  %v2883_v39 = vld [vmem:[%s3898_s1 + $0x140] ss:$12 sps:$4 sm:$0xff]  }
  0x59   :  { %1524 = vmatprep.subr.bf16.mxu1 %v2819_v41  ;;  %v2884_v40 = vld [vmem:[%s3898_s1 + $0x2c0] ss:$12 sps:$4 sm:$0xff]  }
  0x5a   :  { %v2885_v41 = vld [vmem:[%s3898_s1 + $0x80] ss:$12 sps:$4 sm:$0xff]  }
  0x5b   :  { %1484 = vmatpush1.bf16.msra.mxu0 %v2814_v44  ;;  %v2887_v44 = vld [vmem:[%s3898_s1 + $0x128] ss:$12 sps:$4 sm:$0xff]  }
  0x5c   :  { %1525 = vmatpush1.bf16.msra.mxu1 %v2817_v47  ;;  %1485 = vmatprep.subr.bf16.mxu0 %v2822_v48  ;;  %v2892_v47 = vld [vmem:[%s3898_s1 + $0x290] ss:$12 sps:$4 sm:$0xff]  }
  0x5d   :  { %1526 = vmatprep.subr.bf16.mxu1 %v2825_v52  ;;  %v2893_v48 = vld [vmem:[%s3898_s1 + $0x50] ss:$12 sps:$4 sm:$0xff]   ;;  %v2896_v52 = vld [vmem:[%s3898_s1 + $0x278] ss:$12 sps:$4 sm:$0xff]  }
  0x5f   :  { %1486 = vmatpush1.bf16.msra.mxu0 %v2820_v53  ;;  %v2897_v53 = vld [vmem:[%s3898_s1 + $0x38] ss:$12 sps:$4 sm:$0xff]  }
  0x60   :  { %1527 = vmatpush1.bf16.msra.mxu1 %v2823_v49  ;;  %1487 = vmatprep.subr.bf16.mxu0 %v2828_v56  ;;  %v2899_v49 = vld [vmem:[%s3898_s1 + $0xe0] ss:$12 sps:$4 sm:$0xff]  }
  0x61   :  { %1528 = vmatprep.subr.bf16.mxu1 %v2831_v58  ;;  %v2900_v56 = vld [vmem:[%s3898_s1 + $0x260] ss:$12 sps:$4 sm:$0xff]  }
  0x62   :  { %v2901_v58 = vld [vmem:[%s3898_s1 + $0x20] ss:$12 sps:$4 sm:$0xff]  }
  0x63   :  { %1488 = vmatpush2.bf16.msra.mxu0 %v2826_v59  ;;  %v2902_v59 = vld [vmem:[%s3898_s1 + $0x1a0] ss:$12 sps:$4 sm:$0xff]  }
  0x64   :  { %1529 = vmatpush2.bf16.msra.mxu1 %v2829_v60  ;;  %1489 = vmatprep.subr.bf16.mxu0 %v2834_v61  ;;  %v2903_v60 = vld [vmem:[%s3898_s1 + $0xc8] ss:$12 sps:$4 sm:$0xff]  }
  0x65   :  { %1530 = vmatprep.subr.bf16.mxu1 %v2837_v63  ;;  %v2904_v61 = vld [vmem:[%s3898_s1 + $0x248] ss:$12 sps:$4 sm:$0xff]  }
  0x66   :  { %v2905_v63 = vld [vmem:[%s3898_s1 + $0x8] ss:$12 sps:$4 sm:$0xff]  }
  0x67   :  { %1490 = vmatpush2.bf16.msra.mxu0 %v2832_v0  ;;  %v2906_v0 = vld [vmem:[%s3898_s1 + $0x188] ss:$12 sps:$4 sm:$0xff]  }
  0x68   :  { %1531 = vmatpush2.bf16.msra.mxu1 %v2835_v1  ;;  %1491 = vmatprep.subr.bf16.mxu0 %v2840_v2  ;;  %v2907_v1 = vld [vmem:[%s3898_s1 + $0x470] ss:$12 sps:$4 sm:$0xff]  }
  0x69   :  { %1532 = vmatprep.subr.bf16.mxu1 %v2843_v4  ;;  %v2908_v2 = vld [vmem:[%s3898_s1 + $0x5f0] ss:$12 sps:$4 sm:$0xff]  }
  0x6a   :  { %v2909_v4 = vld [vmem:[%s3898_s1 + $0x3b0] ss:$12 sps:$4 sm:$0xff]  }
  0x6b   :  { %1492 = vmatpush2.bf16.msra.mxu0 %v2838_v5  ;;  %v2910_v5 = vld [vmem:[%s3898_s1 + $0x530] ss:$12 sps:$4 sm:$0xff]  }
  0x6c   :  { %1533 = vmatpush2.bf16.msra.mxu1 %v2841_v6  ;;  %1493 = vmatprep.subr.bf16.mxu0 %v2846_v7  ;;  %v2911_v6 = vld [vmem:[%s3898_s1 + $0x458] ss:$12 sps:$4 sm:$0xff]  }
  0x6d   :  { %1534 = vmatprep.subr.bf16.mxu1 %v2849_v8  ;;  %v2912_v7 = vld [vmem:[%s3898_s1 + $0x5d8] ss:$12 sps:$4 sm:$0xff]  }
  0x6e   :  { %v2913_v8 = vld [vmem:[%s3898_s1 + $0x398] ss:$12 sps:$4 sm:$0xff]  }
  0x6f   :  { %1494 = vmatpush2.bf16.msra.mxu0 %v2844_v9  ;;  %v2914_v9 = vld [vmem:[%s3898_s1 + $0x518] ss:$12 sps:$4 sm:$0xff]  }
  0x70   :  { %1535 = vmatpush2.bf16.msra.mxu1 %v2847_v10  ;;  %1495 = vmatprep.subr.bf16.mxu0 %v2852_v11  ;;  %v2915_v10 = vld [vmem:[%s3898_s1 + $0x440] ss:$12 sps:$4 sm:$0xff]  }
  0x71   :  { %1536 = vmatprep.subr.bf16.mxu1 %v2855_v12  ;;  %v2916_v11 = vld [vmem:[%s3898_s1 + $0x5c0] ss:$12 sps:$4 sm:$0xff]  }
  0x72   :  { %v2917_v12 = vld [vmem:[%s3898_s1 + $0x380] ss:$12 sps:$4 sm:$0xff]  }
  0x73   :  { %1496 = vmatpush2.bf16.msra.mxu0 %v2850_v13  ;;  %v2920_v13 = vld [vmem:[%s3898_s1 + $0x5a8] ss:$12 sps:$4 sm:$0xff]  }
  0x74   :  { %1537 = vmatpush2.bf16.msra.mxu1 %v2853_v14  ;;  %1497 = vmatprep.subr.bf16.mxu0 %v2858_v15  ;;  %v2921_v14 = vld [vmem:[%s3898_s1 + $0x368] ss:$12 sps:$4 sm:$0xff]   ;;  %v2924_v15 = vld [vmem:[%s3898_s1 + $0x590] ss:$12 sps:$4 sm:$0xff]  }
  0x75   :  { %1538 = vmatprep.subr.bf16.mxu1 %v2861_v18  ;;  %v2925_v18 = vld [vmem:[%s3898_s1 + $0x350] ss:$12 sps:$4 sm:$0xff]  }
  0x77   :  { %1498 = vmatpush2.bf16.msra.mxu0 %v2856_v19  ;;  %v2926_v19 = vld [vmem:[%s3898_s1 + $0x4d0] ss:$12 sps:$4 sm:$0xff]  }
  0x78   :  { %1539 = vmatpush2.bf16.msra.mxu1 %v2859_v20  ;;  %1499 = vmatprep.subr.bf16.mxu0 %v2864_v21  ;;  %v2927_v20 = vld [vmem:[%s3898_s1 + $0x3f8] ss:$12 sps:$4 sm:$0xff]  }
  0x79   :  { %1540 = vmatprep.subr.bf16.mxu1 %v2867_v22  ;;  %v2928_v21 = vld [vmem:[%s3898_s1 + $0x578] ss:$12 sps:$4 sm:$0xff]  }
  0x7b   :  { %1500 = vmatpush2.bf16.msra.mxu0 %v2862_v23 }
  0x7c   :  { %1541 = vmatpush2.bf16.msra.mxu1 %v2865_v24  ;;  %1501 = vmatprep.subr.bf16.mxu0 %v2870_v25 }
  0x7d   :  { %1542 = vmatprep.subr.bf16.mxu1 %v2873_v26 }
  0x7f   :  { %1502 = vmatpush2.bf16.msra.mxu0 %v2868_v27 }
  0x80   :  { %1543 = vmatpush2.bf16.msra.mxu1 %v2871_v28  ;;  %2531 = vmatprep.subr.bf16.mxu0 %v2875_v29 }
  0x81   :  { %2553 = vmatprep.subr.bf16.mxu1 %v2876_v30 }
  0x82   :  { %1504 = vmatmul.mubr.bf16.vlgmr.msra.gmra.mxu0 %v3536_v32 }
  0x83   :  { %1545 = vmatmul.mubr.bf16.vlgmr.msra.gmra.mxu1 %v3540_v33  ;;  %2532 = vmatpush3.bf16.msra.mxu0 %v2877_v31 }
  0x84   :  { %2554 = vmatpush3.bf16.msra.mxu1 %v2878_v34  ;;  %2533 = vmatprep.subr.bf16.mxu0 %v2879_v35 }
  0x85   :  { %2555 = vmatprep.subr.bf16.mxu1 %v2880_v36  ;;  %1585 = vmatprep.mubr.bf16.mxu0 %v3263_v62  ;;  %v2889_v62 = vld [vmem:[%s3898_s1 + $0x68] ss:$12 sps:$4 sm:$0xff]  }
  0x86   :  { %1625 = vmatprep.mubr.bf16.mxu1 %v3274_v3  ;;  %v2890_v3 = vld [vmem:[%s3898_s1 + $0x1e8] ss:$12 sps:$4 sm:$0xff]  }
  0x87   :  { %2534 = vmatpush3.bf16.msra.mxu0 %v2881_v37 }
  0x88   :  { %2556 = vmatpush3.bf16.msra.mxu1 %v2882_v38  ;;  %2535 = vmatprep.subr.bf16.mxu0 %v2883_v39 }
  0x89   :  { %2557 = vmatprep.subr.bf16.mxu1 %v2884_v40 }
  0x8b   :  { %2536 = vmatpush3.bf16.msra.mxu0 %v2885_v41 }
  0x8c   :  { %2558 = vmatpush3.bf16.msra.mxu1 %v2886_v42  ;;  %2537 = vmatprep.subr.bf16.mxu0 %v2887_v44 }
  0x8d   :  { %2559 = vmatprep.subr.bf16.mxu1 %v2888_v45 }
  0x8f   :  { %2538 = vmatpush3.bf16.msra.mxu0 %v2889_v62 }
  0x90   :  { %2560 = vmatpush3.bf16.msra.mxu1 %v2890_v3  ;;  %2539 = vmatprep.subr.bf16.mxu0 %v2891_v46 }
  0x91   :  { %2561 = vmatprep.subr.bf16.mxu1 %v2892_v47 }
  0x93   :  { %2540 = vmatpush3.bf16.msra.mxu0 %v2893_v48 }
  0x94   :  { %2562 = vmatpush3.bf16.msra.mxu1 %v2894_v50  ;;  %2541 = vmatprep.subr.bf16.mxu0 %v2895_v51 }
  0x95   :  { %2563 = vmatprep.subr.bf16.mxu1 %v2896_v52 }
  0x97   :  { %2542 = vmatpush3.bf16.msra.mxu0 %v2897_v53 }
  0x98   :  { %2564 = vmatpush3.bf16.msra.mxu1 %v2898_v55  ;;  %2543 = vmatprep.subr.bf16.mxu0 %v2899_v49 }
  0x99   :  { %2565 = vmatprep.subr.bf16.mxu1 %v2900_v56 }
  0x9b   :  { %2544 = vmatpush3.bf16.msra.mxu0 %v2901_v58 }
  0x9c   :  { %2566 = vmatpush3.bf16.msra.mxu1 %v2902_v59  ;;  %2545 = vmatprep.subr.bf16.mxu0 %v2903_v60 }
  0x9d   :  { %2567 = vmatprep.subr.bf16.mxu1 %v2904_v61 }
  0x9f   :  { %2546 = vmatpush3.bf16.msra.mxu0 %v2905_v63 }
  0xa0   :  { %2568 = vmatpush3.bf16.msra.mxu1 %v2906_v0  ;;  %2575 = vmatprep.subr.bf16.mxu0 %v2907_v1 }
  0xa1   :  { %2597 = vmatprep.subr.bf16.mxu1 %v2908_v2 }
  0xa2   :  { %1586 = vmatmul.mubr.bf16.vlgmr.msra.gmra.mxu0 %v3314_v16  ;;  %v2918_v16 = vld [vmem:[%s3898_s1 + $0x500] ss:$12 sps:$4 sm:$0xff]  }
  0xa3   :  { %1626 = vmatmul.mubr.bf16.vlgmr.msra.gmra.mxu1 %v3316_v17  ;;  %2576 = vmatpush3.bf16.msra.mxu0 %v2909_v4  ;;  %v2919_v17 = vld [vmem:[%s3898_s1 + $0x428] ss:$12 sps:$4 sm:$0xff]  }
  0xa4   :  { %2598 = vmatpush3.bf16.msra.mxu1 %v2910_v5  ;;  %2577 = vmatprep.subr.bf16.mxu0 %v2911_v6 }
  0xa5   :  { %2599 = vmatprep.subr.bf16.mxu1 %v2912_v7  ;;  %1665 = vmatprep.mubr.bf16.mxu0 %v3418_v54  ;;  %v2922_v54 = vld [vmem:[%s3898_s1 + $0x4e8] ss:$12 sps:$4 sm:$0xff]  }
  0xa6   :  { %1705 = vmatprep.mubr.bf16.mxu1 %v3428_v57  ;;  %v2923_v57 = vld [vmem:[%s3898_s1 + $0x410] ss:$12 sps:$4 sm:$0xff]  }
  0xa7   :  { %2578 = vmatpush3.bf16.msra.mxu0 %v2913_v8 }
  0xa8   :  { %2600 = vmatpush3.bf16.msra.mxu1 %v2914_v9  ;;  %2579 = vmatprep.subr.bf16.mxu0 %v2915_v10 }
  0xa9   :  { %2601 = vmatprep.subr.bf16.mxu1 %v2916_v11 }
  0xab   :  { %2580 = vmatpush3.bf16.msra.mxu0 %v2917_v12 }
  0xac   :  { %2602 = vmatpush3.bf16.msra.mxu1 %v2918_v16  ;;  %2581 = vmatprep.subr.bf16.mxu0 %v2919_v17 }
  0xad   :  { %2603 = vmatprep.subr.bf16.mxu1 %v2920_v13 }
  0xaf   :  { %2582 = vmatpush3.bf16.msra.mxu0 %v2921_v14 }
  0xb0   :  { %2604 = vmatpush3.bf16.msra.mxu1 %v2922_v54  ;;  %2583 = vmatprep.subr.bf16.mxu0 %v2923_v57 }
  0xb1   :  { %2605 = vmatprep.subr.bf16.mxu1 %v2924_v15 }
  0xb2   :  { %18 = vsyncpa [#allocation5], 0  ;;  %v2929_v22 = vld [vmem:[%s3898_s1 + $0x338] ss:$12 sps:$4 sm:$0xff]   ;;  %v2931_v24 = vld [vmem:[%s3898_s1 + $0x3e0] ss:$12 sps:$4 sm:$0xff]  }
  0xb3   :  { %2584 = vmatpush3.bf16.msra.mxu0 %v2925_v18  ;;  %v2930_v23 = vld [vmem:[%s3898_s1 + $0x4b8] ss:$12 sps:$4 sm:$0xff]   ;;  %v2932_v25 = vld [vmem:[%s3898_s1 + $0x560] ss:$12 sps:$4 sm:$0xff]   ;;  %v2935_v28 = vld [vmem:[%s3898_s1 + $0x3c8] ss:$12 sps:$4 sm:$0xff]  }
  0xb4   :  { %2606 = vmatpush3.bf16.msra.mxu1 %v2926_v19  ;;  %2585 = vmatprep.subr.bf16.mxu0 %v2927_v20  ;;  %v2933_v26 = vld [vmem:[%s3898_s1 + $0x320] ss:$12 sps:$4 sm:$0xff]   ;;  %v2936_v29 = vld [vmem:[%s3898_s1 + $0x548] ss:$12 sps:$4 sm:$0xff]   ;;  %v2939_v34 = vld [vmem:[%s3900_s3 + $0x78] sm:$0xff]   ;;  %v3034_v55 = vmov 0.0  }
  0xb5   :  { %2607 = vmatprep.subr.bf16.mxu1 %v2928_v21  ;;  %v2934_v27 = vld [vmem:[%s3898_s1 + $0x4a0] ss:$12 sps:$4 sm:$0xff]   ;;  %v2937_v30 = vld [vmem:[%s3898_s1 + $0x308] ss:$12 sps:$4 sm:$0xff]   ;;  %v2940_v35 = vld [vmem:[%s3900_s3 + $0x38] sm:$0xff]   ;;  %v352_v58 = vsub.s32 0, %v3217_v43 }
  0xb6   :  { %v2938_v31 = vld [vmem:[%s3898_s1 + $0x488] ss:$12 sps:$4 sm:$0xff]   ;;  %v2947_v40 = vld [vmem:[%s3900_s3 + $0x58] sm:$0xff]   ;;  %v2953_v3 = vld [vmem:[%s3900_s3 + $0x40] sm:$0xff]   ;;  %v356_v60 = vsub.s32 1, %v3217_v43  ;;  %vm3035_vm0 = vmmov 0  }
  0xb7   :  { %2586 = vmatpush3.bf16.msra.mxu0 %v2929_v22  ;;  %v2941_v36 = vld [vmem:[%s3900_s3 + $0x70] sm:$0xff]   ;;  %v2943_v38 = vld [vmem:[%s3900_s3 + $0x68] sm:$0xff]   ;;  %v2948_v41 = vld [vmem:[%s3900_s3 + $0x18] sm:$0xff]   ;;  %vm1870_vm1 = vcmask 261120   ;;  %vm2016_vm2 = vcmask 523264   ;;  %vm2240_vm3 = vcmask 41984  }
  0xb8   :  { %2608 = vmatpush3.bf16.msra.mxu1 %v2930_v23  ;;  %2587 = vmatprep.subr.bf16.mxu0 %v2931_v24  ;;  %v2942_v37 = vld [vmem:[%s3900_s3 + $0x30] sm:$0xff]   ;;  %v2944_v39 = vld [vmem:[%s3900_s3 + $0x28] sm:$0xff]   ;;  %v2954_v46 = vld [vmem:[%s3900_s3] sm:$0xff]   ;;  %s3037_s30 = smov 122   ;;  %vm2259_vm4 = vcmask 1024  }
  0xb9   :  { %2609 = vmatprep.subr.bf16.mxu1 %v2932_v25  ;;  %v2949_v42 = vld [vmem:[%s3900_s3 + $0x50] sm:$0xff]   ;;  %v2951_v45 = vld [vmem:[%s3900_s3 + $0x48] sm:$0xff]   ;;  %v348_v59 = vld [vmem:[%s3899_s2] sm:$0x7] }
  0xba   :  { %v2950_v44 = vld [vmem:[%s3900_s3 + $0x10] sm:$0xff]   ;;  %v2952_v62 = vld [vmem:[%s3900_s3 + $0x8] sm:$0xff]   ;;  %v353_v61 = vrot.slane %v348_v59, %v352_v58  ;;  %v357_v63 = vrot.slane %v348_v59, %v356_v60  ;;  %v2956_v20 = vld [vmem:[%s3900_s3 + $0x80] sm:$0xff]  }
  0xbb   :  { %2588 = vmatpush3.bf16.msra.mxu0 %v2933_v26  ;;  %v2955_v18 = vld [vmem:[%s3900_s3 + $0x88] sm:$0xff]  }
  0xbc   :  { %2610 = vmatpush3.bf16.msra.mxu1 %v2934_v27  ;;  %2589 = vmatprep.subr.bf16.mxu0 %v2935_v28 }
  0xbd   :  { %2611 = vmatprep.subr.bf16.mxu1 %v2936_v29  ;;  %v360_v29 = vsub.s32 2, %v3217_v43 }
  0xbf   :  { %2590 = vmatpush3.bf16.msra.mxu0 %v2937_v30  ;;  %v361_v30 = vrot.slane %v348_v59, %v360_v29  ;;  %v3036_v59 = vmov 0  }
  0xc0   :  { %2612 = vmatpush3.bf16.msra.mxu1 %v2938_v31  ;;  %2619 = vmatprep.subr.bf16.mxu0 %v2939_v34 }
  0xc2   :  { %1666 = vmatmul.mubr.bf16.vlgmr.msra.gmra.mxu0 %v3536_v32  ;;  %v2945_v32 = vld [vmem:[%s3900_s3 + $0x60] sm:$0xff]  }
  0xc3   :  { %1706 = vmatmul.mubr.bf16.vlgmr.msra.gmra.mxu1 %v3540_v33  ;;  %2620 = vmatpush3.bf16.msra.mxu0 %v2940_v35  ;;  %v2946_v33 = vld [vmem:[%s3900_s3 + $0x20] sm:$0xff]  }
  0xc4   :  { %2621 = vmatprep.subr.bf16.mxu0 %v2941_v36  ;;  %2052 = vmatprep.mubr.bf16.mxu1 %v3036_v59 }
  0xc7   :  { %2622 = vmatpush3.bf16.msra.mxu0 %v2942_v37 }
  0xc8   :  { %2623 = vmatprep.subr.bf16.mxu0 %v2943_v38 }
  0xcb   :  { %2624 = vmatpush3.bf16.msra.mxu0 %v2944_v39 }
  0xcc   :  { %2625 = vmatprep.subr.bf16.mxu0 %v2945_v32 }
  0xcf   :  { %2626 = vmatpush3.bf16.msra.mxu0 %v2946_v33 }
  0xd0   :  { %2627 = vmatprep.subr.bf16.mxu0 %v2947_v40 }
  0xd3   :  { %2628 = vmatpush3.bf16.msra.mxu0 %v2948_v41 }
  0xd4   :  { %2629 = vmatprep.subr.bf16.mxu0 %v2949_v42 }
  0xd7   :  { %2630 = vmatpush3.bf16.msra.mxu0 %v2950_v44 }
  0xd8   :  { %2631 = vmatprep.subr.bf16.mxu0 %v2951_v45 }
  0xdb   :  { %2632 = vmatpush3.bf16.msra.mxu0 %v2952_v62 }
  0xdc   :  { %2633 = vmatprep.subr.bf16.mxu0 %v2953_v3 }
  0xdf   :  { %2634 = vmatpush3.bf16.msra.mxu0 %v2954_v46 }
  0xe0   :  { %2666 = vmatprep.subr.bf16.mxu0 %v3034_v55 }
 0x102   :  { %v1423_v47 = vpop.f32.mrf.mxu0 }
 0x103   :  { %v1464_v48 = vpop.f32.mrf.mxu1  ;;  %v1424_v0 = vadd.f32 %v1423_v47, %v353_v61  ;;  %v2969_v61 = vld [vmem:[%s3904_s7 + $0x78] sm:$0xff]  }
 0x104   :  { %v1425_v50 = vpop.f32.mrf.mxu0 }
 0x105   :  { %v1466_v51 = vpop.f32.mrf.mxu1  ;;  %v1426_v1 = vadd.f32 %v1425_v50, %v357_v63  ;;  %v1465_v2 = vadd.f32 %v1464_v48, %v1424_v0  ;;  %v2957_v48 = vld [vmem:[%s3902_s5 + $0x30] ss:$8 sps:$4 sm:$0xff]   ;;  %v2959_v50 = vld [vmem:[%s3902_s5 + $0x34] ss:$8 sps:$4 sm:$0xff]  }
 0x106   :  { %v1427_v52 = vpop.f32.mrf.mxu0  ;;  %2028 = vmatprep.subr.bf16.mxu1 %v2959_v50 }
 0x107   :  { %v1468_v53 = vpop.f32.mrf.mxu1  ;;  %v1467_v6 = vadd.f32 %v1466_v51, %v1426_v1  ;;  %v2962_v51 = vld [vmem:[%s3902_s5 + $0x24] ss:$8 sps:$4 sm:$0xff]   ;;  %2029 = vmatpush1.bf16.msra.mxu1 %v2957_v48  ;;  %v2960_v52 = vld [vmem:[%s3902_s5 + $0x20] ss:$8 sps:$4 sm:$0xff]  }
 0x108   :  { %v1428_v49 = vpop.f32.mrf.mxu0  ;;  %2030 = vmatprep.subr.bf16.mxu1 %v2962_v51  ;;  %v2965_v53 = vld [vmem:[%s3902_s5 + $0x14] ss:$8 sps:$4 sm:$0xff]  }
 0x109   :  { %v1469_v56 = vpop.f32.mrf.mxu1  ;;  %v2968_v49 = vld [vmem:[%s3902_s5 + $0x4] ss:$8 sps:$4 sm:$0xff]  }
 0x10a   :  { %v2966_v56 = vld [vmem:[%s3902_s5] ss:$8 sps:$4 sm:$0xff]  }
 0x10b   :  { %2031 = vmatpush1.bf16.msra.mxu1 %v2960_v52 }
 0x10c   :  { %2032 = vmatprep.subr.bf16.mxu1 %v2965_v53 }
 0x142   :  { %v1505_v4 = vpop.f32.mrf.mxu0 }
 0x143   :  { %v1546_v5 = vpop.f32.mrf.mxu1  ;;  %v1506_v7 = vadd.f32 %v1505_v4, %v1465_v2 }
 0x144   :  { %v1507_v8 = vpop.f32.mrf.mxu0 }
 0x145   :  { %v1548_v9 = vpop.f32.mrf.mxu1  ;;  %v1547_v10 = vadd.f32 %v1546_v5, %v1506_v7  ;;  %v1508_v11 = vadd.f32 %v1507_v8, %v1467_v6  ;;  %v2485_v5 = vld [vmem:[%s3901_s4] ss:$0 sm:$0xff] }
 0x146   :  { %v1509_v12 = vpop.f32.mrf.mxu0 }
 0x147   :  { %v1550_v16 = vpop.f32.mrf.mxu1  ;;  %v1549_v17 = vadd.f32 %v1548_v9, %v1508_v11  ;;  %v1713_v13 = vmax.f32 %v1547_v10, 0.0  ;;  %v2970_v12 = vld [vmem:[%s3904_s7 + $0x38] sm:$0xff]  }
 0x148   :  { %v1510_v14 = vpop.f32.mrf.mxu0 }
 0x149   :  { %v1551_v54 = vpop.f32.mrf.mxu1  ;;  %v1714_v57 = vmax.f32 %v1549_v17, 0.0  ;;  %v1716_v19 = vpack.c.bf16 %v1713_v13, %v1713_v13  ;;  %v2971_v17 = vld [vmem:[%s3904_s7 + $0x70] sm:$0xff]  }
 0x14a   :  { %v2972_v14 = vld [vmem:[%s3904_s7 + $0x30] sm:$0xff]   ;;  %v2973_v54 = vld [vmem:[%s3904_s7 + $0x68] sm:$0xff]  }
 0x14b   :  { %v1717_v15 = vpack.c.bf16 %v1714_v57, %v1714_v57  ;;  %v2974_v57 = vld [vmem:[%s3904_s7 + $0x28] sm:$0xff]  }
 0x14d   :  { %1906 = vmatprep.mubr.bf16.mxu0 %v1717_v15  ;;  %v2975_v15 = vld [vmem:[%s3904_s7 + $0x60] sm:$0xff]  }
 0x14e   :  { %1907 = vmatmul.mubr.bf16.vlgmr.msra.gmra.mxu0 %v1716_v19  ;;  %v2977_v19 = vld [vmem:[%s3904_s7 + $0x58] sm:$0xff]  }
 0x14f   :  { %2667 = vmatpush3.bf16.msra.mxu0 %v2955_v18  ;;  %2670 = vmatprep.mubr.msk.bf16.mxu0 %vm3035_vm0, %v3034_v55  ;;  %v2976_v18 = vld [vmem:[%s3904_s7 + $0x20] sm:$0xff]  }
 0x150   :  { %2668 = vmatprep.subr.bf16.mxu0 %v3034_v55  ;;  %v2963_v55 = vld [vmem:[%s3902_s5 + $0x10] ss:$8 sps:$4 sm:$0xff]  }
 0x151   :  { %2033 = vmatpush1.bf16.msra.mxu1 %v2963_v55 }
 0x152   :  { %2034 = vmatprep.subr.bf16.mxu1 %v2968_v49 }
 0x153   :  { %2669 = vmatpush3.bf16.msra.mxu0 %v2956_v20  ;;  %v2978_v20 = vld [vmem:[%s3904_s7 + $0x18] sm:$0xff]  }
 0x155   :  { %2035 = vmatpush1.bf16.msra.mxu1 %v2966_v56 }
 0x156   :  { %2644 = vmatprep.subr.bf16.mxu1 %v2969_v61 }
 0x162   :  { %v2547_v21 = vpop.f32.mrf.mxu0 }
 0x163   :  { %v2569_v22 = vpop.f32.mrf.mxu1 }
 0x164   :  { %v2548_v23 = vpop.f32.mrf.mxu0 }
 0x165   :  { %v2570_v24 = vpop.f32.mrf.mxu1  ;;  %v2549_v31 = vadd.f32 %v2548_v23, %v2547_v21  ;;  %v2979_v21 = vld [vmem:[%s3904_s7 + $0x50] sm:$0xff]   ;;  %v2981_v23 = vld [vmem:[%s3904_s7 + $0x48] sm:$0xff]  }
 0x166   :  { %v2550_v25 = vpop.f32.mrf.mxu0  ;;  %v2571_v35 = vadd.f32 %v2570_v24, %v2569_v22  ;;  %v2980_v22 = vld [vmem:[%s3904_s7 + $0x10] sm:$0xff]   ;;  %v2982_v24 = vld [vmem:[%s3904_s7 + $0x8] sm:$0xff]  }
 0x167   :  { %v2572_v26 = vpop.f32.mrf.mxu1  ;;  %v1588_v34 = vadd.f32 %v2549_v31, %v361_v30  ;;  %v2983_v25 = vld [vmem:[%s3904_s7 + $0x40] sm:$0xff]  }
 0x168   :  { %v2551_v27 = vpop.f32.mrf.mxu0  ;;  %v2984_v26 = vld [vmem:[%s3904_s7] sm:$0xff]  }
 0x169   :  { %v2573_v28 = vpop.f32.mrf.mxu1  ;;  %v1628_v32 = vadd.f32 %v2571_v35, %v1588_v34  ;;  %v1964_v27 = vld [vmem:[%s3903_s6] sm:$0x3] }
 0x16a   :  { %v1969_v28 = vrot.slane %v1964_v27, %v352_v58  ;;  %v1973_v29 = vrot.slane %v1964_v27, %v356_v60  ;;  %v2514_v58 = vld [vmem:[%s3905_s8] ss:$0 sm:$0xff]  ;;  %s3038_s8 = smov [#allocation2]  }
 0x16b   :  { %s2267_s14 = sshll.u32 %s3038_s8, 4  ;;  %s2268_s14 = int_to_ptr.vmem [resolvable:$true] %s2267_s14 }
 0x16c   :  { %s2989_s15 = scalar_lea.vmem %s2268_s14, 32  ;;  %p2994_p1 = scmp.lt.s32.totalorder %s2268_s14, %s2268_s14 }
 0x16d   :  { %p2990_p0 = scmp.ne.s32.totalorder %s2268_s14, %s2989_s15  ;;  %p2995_p2 = scmp.lt.s32.totalorder %s2989_s15, %s2989_s15 }
 0x16f   :  { %p2996_p3 = por %p2995_p2, %p2994_p1 }
 0x171   :  { %p2997_p4 = pnand %p2996_p3, %p2990_p0 }
 0x182   :  { %v2591_v36 = vpop.f32.mrf.mxu0 }
 0x183   :  { %v2613_v37 = vpop.f32.mrf.mxu1 }
 0x184   :  { %v2592_v38 = vpop.f32.mrf.mxu0 }
 0x185   :  { %v2614_v39 = vpop.f32.mrf.mxu1  ;;  %v2593_v33 = vadd.f32 %v2592_v38, %v2591_v36 }
 0x186   :  { %v2594_v40 = vpop.f32.mrf.mxu0  ;;  %v2615_v44 = vadd.f32 %v2614_v39, %v2613_v37 }
 0x187   :  { %v2616_v41 = vpop.f32.mrf.mxu1  ;;  %v1668_v42 = vadd.f32 %v2593_v33, %v1628_v32 }
 0x188   :  { %v2595_v45 = vpop.f32.mrf.mxu0 }
 0x189   :  { %v2617_v62 = vpop.f32.mrf.mxu1  ;;  %v1708_v3 = vadd.f32 %v2615_v44, %v1668_v42 }
 0x18b   :  { %v1715_v46 = vmax.f32 %v1708_v3, 0.0 }
 0x18d   :  { %v1718_v47 = vpack.c.bf16 %v1715_v46, %v1715_v46 }
 0x18f   :  { %2671 = vmatmul.mubr.msk.bf16.vlgmr.msra.gmra.mxu0 %vm1870_vm1, %v1718_v47 }
 0x20e   :  { %v2635_v63 = vpop.f32.mrf.mxu0 }
 0x210   :  { %v2636_v0 = vpop.f32.mrf.mxu0 }
 0x211   :  { %v2637_v4 = vadd.f32 %v2636_v0, %v2635_v63 }
 0x212   :  { %v2638_v1 = vpop.f32.mrf.mxu0 }
 0x213   :  { %v1909_v6 = vadd.f32 %v2637_v4, %v2485_v5 }
 0x214   :  { %v2639_v2 = vpop.f32.mrf.mxu0 }
 0x24f   :  { %v1948_v7 = vpop.f32.mrf.mxu0 }
 0x250   :  { %v1949_v8 = vadd.f32 %v1948_v7, %v1909_v6 }
 0x251   :  { %v2672_v9 = vpop.f32.mrf.mxu0 }
 0x252   :  { %v1954_v10 = vmax.f32 %v1949_v8, 0.0 }
 0x253   :  { %v1951_v11 = vpop.f32.mrf.mxu0 }
 0x254   :  { %v1955_v16 = vpack.c.bf16 %v1954_v10, %v1954_v10 }
 0x255   :  { %v2673_v13 = vpop.f32.mrf.mxu0 }
 0x256   :  { %2513 = vmatmul.mubr.msk.bf16.vlgmr.msra.gmra.mxu1 %vm2016_vm2, %v1955_v16 }
 0x257   :  { %2645 = vmatpush3.bf16.msra.mxu1 %v2970_v12 }
 0x258   :  { %2646 = vmatprep.subr.bf16.mxu1 %v2971_v17 }
 0x25b   :  { %2647 = vmatpush3.bf16.msra.mxu1 %v2972_v14 }
 0x25c   :  { %2648 = vmatprep.subr.bf16.mxu1 %v2973_v54 }
 0x25f   :  { %2649 = vmatpush3.bf16.msra.mxu1 %v2974_v57 }
 0x260   :  { %2650 = vmatprep.subr.bf16.mxu1 %v2975_v15 }
 0x263   :  { %2651 = vmatpush3.bf16.msra.mxu1 %v2976_v18 }
 0x264   :  { %2652 = vmatprep.subr.bf16.mxu1 %v2977_v19 }
 0x267   :  { %2653 = vmatpush3.bf16.msra.mxu1 %v2978_v20 }
 0x268   :  { %2654 = vmatprep.subr.bf16.mxu1 %v2979_v21 }
 0x26b   :  { %2655 = vmatpush3.bf16.msra.mxu1 %v2980_v22 }
 0x26c   :  { %2656 = vmatprep.subr.bf16.mxu1 %v2981_v23 }
 0x26f   :  { %2657 = vmatpush3.bf16.msra.mxu1 %v2982_v24 }
 0x270   :  { %2658 = vmatprep.subr.bf16.mxu1 %v2983_v25 }
 0x273   :  { %2659 = vmatpush3.bf16.msra.mxu1 %v2984_v26 }
 0x316   :  { %v2054_v30 = vpop.f32.mrf.mxu1 }
 0x317   :  { %v2055_v31 = vadd.f32 %v2054_v30, %v1969_v28 }
 0x318   :  { %v2056_v34 = vpop.f32.mrf.mxu1 }
 0x319   :  { %v2057_v35 = vadd.f32 %v2056_v34, %v1973_v29  ;;  %v2061_v36 = vmax.f32 %v2055_v31, 0.0 }
 0x31a   :  { %v2058_v37 = vpop.f32.mrf.mxu1 }
 0x31b   :  { %v2062_v38 = vmax.f32 %v2057_v35, 0.0  ;;  %v2063_v33 = vpack.c.bf16 %v2061_v36, %v2061_v36 }
 0x31c   :  { %v2059_v39 = vpop.f32.mrf.mxu1 }
 0x31d   :  { %v2064_v32 = vpack.c.bf16 %v2062_v38, %v2062_v38 }
 0x31f   :  { %2232 = vmatprep.mubr.bf16.mxu1 %v2064_v32 }
 0x320   :  { %2233 = vmatmul.mubr.bf16.vlgmr.msra.gmra.mxu1 %v2063_v33 }
 0x3e0   :  { %v2660_v40 = vpop.f32.mrf.mxu1 }
 0x3e2   :  { %v2661_v41 = vpop.f32.mrf.mxu1 }
 0x3e3   :  { %v2662_v43 = vadd.f32 %v2661_v41, %v2660_v40 }
 0x3e4   :  { %v2663_v60 = vpop.f32.mrf.mxu1 }
 0x3e5   :  { %v2235_v42 = vadd.f32 %v2662_v43, %v2514_v58 }
 0x3e6   :  { %v2664_v44 = vpop.f32.mrf.mxu1 }
 0x3e7   :  { %2256 = vrot.lane.b32.xlu1 %v2235_v42, %s3037_s30  ;;  %v2241_v45 = vsel %vm2240_vm3, %v2235_v42, -inf  ;;  %2252 = vst.msk [vmem:[#allocation2] sm:$0x3] %vm2240_vm3, %v2235_v42 }
 0x3e8   :  { %2242 = vmax.xlane.f32.xlu0 %v2241_v45 }
 0x459   :  { %v2257_v62 = vpop.permute.xlu1 %2256 }
 0x45a   :  { %2260 = vst.msk [vmem:[%s3908_s11] sm:$0x3] %vm2259_vm4, %v2257_v62 }
 0x471   :  { %v2243_v3 = vpop.xlane.xlu0 %2242 }
 0x472   :  { %v2244_v46 = vsub.f32 %v2235_v42, %v2243_v3 }
 0x474   :  { %v2245_v47 = vmul.f32 1.442695, %v2244_v46 }
 0x476   :  { %2985 = vpow2.f32 %v2245_v47 }
 0x483   :  { %v2986_v48 = vpop.eup %2985 }
 0x484   :  { %v2247_v50 = vsel %vm2240_vm3, %v2986_v48, 0.0 }
 0x485   :  { %2248 = vadd.xlane.f32.xlu0 %v2247_v50 }
 0x486   :  { %3000 = shalt.err (!%p2997_p4)
}
 0x487   :  { %2270 = dma.vmem_to_hbm [thread:$0]  %s2268_s14, 32, %s3906_s9, [#allocation3]  }
 0x488   :  { %s3039_s0 = smov [#allocation4]  }
 0x489   :  { %s2277_s17 = sshll.u32 %s3039_s0, 4  ;;  %s2278_s17 = int_to_ptr.vmem [resolvable:$true] %s2277_s17 }
 0x48a   :  { %s3009_s18 = scalar_lea.vmem %s2278_s17, 32  ;;  %p3014_p6 = scmp.lt.s32.totalorder %s2278_s17, %s2278_s17 }
 0x48b   :  { %p3010_p5 = scmp.ne.s32.totalorder %s2278_s17, %s3009_s18  ;;  %p3015_p7 = scmp.lt.s32.totalorder %s3009_s18, %s3009_s18 }
 0x48d   :  { %p3016_p8 = por %p3015_p7, %p3014_p6 }
 0x48f   :  { %p3017_p9 = pnand %p3016_p8, %p3010_p5 }
 0x50e   :  { %v2249_v51 = vpop.xlane.xlu0 %2248 }
 0x50f   :  { %2987 = vlog2.f32 %v2249_v51 }
 0x51c   :  { %v2988_v52 = vpop.eup %2987 }
 0x51d   :  { %v2251_v53 = vmul.f32 0.6931472, %v2988_v52 }
 0x51f   :  { %v2253_v55 = vsub.f32 %v2244_v46, %v2251_v53 }
 0x521   :  { %2254 = vst.msk [vmem:[#allocation4] sm:$0x3] %vm2240_vm3, %v2253_v55 }
 0x522   :  { %3020 = shalt.err (!%p3017_p9)
}
 0x523   :  { %2280 = dma.vmem_to_hbm [thread:$0]  %s2278_s17, 32, %s3907_s10, [#allocation5]  }
 0x524   :  { %3029 = dma.done.wait [#allocation3], 32  }
 0x525   :  { %3030 = vsyncadd [#allocation3], 4294967264 }
 0x526   :  { %3031 = dma.done.wait [#allocation5], 32  }
 0x527   :  { %3032 = vsyncadd [#allocation5], 4294967264 }
 0x528   :  { %2291 = vsyncpa [#allocation3], 1 }
 0x529   :  { %2292 = vsyncpa [#allocation5], 1 }

</bundles_post_ra>
